<compile_context>
chip_gen: v7x
topology: tpu7x:2x2x1
jax: 0.10.0
libtpu: 0.0.40
codegen_flags: <defaults>
</compile_context>

<pallas_src>
import functools

import jax
import jax.numpy as jnp
from jax import lax
from jax.experimental import pallas as pl
from jax.experimental.pallas import tpu as pltpu

ACT_DTYPE = jnp.bfloat16       # HBM / MXU-input / scratch dtype (accumulation stays f32)


def _round_up(v, m):
    return (v + m - 1) // m * m


# ---------------------------------------------------------------------------
# Fused kernel:  concat -> reflect-pad -> conv3x3+bias+ReLU  (x2 stages)
# Data layout inside the kernel: (channels, flattened padded HxW grid), bf16.
# ---------------------------------------------------------------------------
def _fused_double_conv_kernel(x2_ref, x1_ref, col_ref,
                              w1_ref, b1_ref, w2_ref, b2_ref,
                              o_ref, s1_ref, s2_ref, *, H, W, M0):
    Hp, Wp = H + 2, W + 2
    L = Hp * Wp                # flattened padded grid (lane axis)

    C2 = x2_ref.shape[1]
    C1 = x1_ref.shape[1]
    cin_pad = s1_ref.shape[0]

    # border masks over the flat padded grid (no vector int div/mod needed)
    pos = lax.broadcasted_iota(jnp.int32, (1, L), 1)
    col = col_ref[...]                           # precomputed p % Wp
    top_m = pos < Wp
    bot_m = pos >= (Hp - 1) * Wp
    lef_m = col == 0
    rig_m = col == (Wp - 1)

    def reflect_fixup(s_ref):
        # vertical reflect (row 0 <- row 2, row Hp-1 <- row Hp-3) ...
        cur = s_ref[:, M0:M0 + L]
        dn2 = s_ref[:, M0 + 2 * Wp: M0 + 2 * Wp + L]
        up2 = s_ref[:, M0 - 2 * Wp: M0 - 2 * Wp + L]
        cur = jnp.where(top_m, dn2, cur)          # keep as select: unselected
        cur = jnp.where(bot_m, up2, cur)          # margin lanes may be garbage
        s_ref[:, M0:M0 + L] = cur
        # ... then horizontal reflect (col 0 <- col 2, col Wp-1 <- col Wp-3);
        # order makes the corners come out right (== PyTorch reflect pad).
        cur = s_ref[:, M0:M0 + L]
        rt2 = s_ref[:, M0 + 2: M0 + 2 + L]
        lt2 = s_ref[:, M0 - 2: M0 - 2 + L]
        cur = jnp.where(lef_m, rt2, cur)
        cur = jnp.where(rig_m, lt2, cur)
        s_ref[:, M0:M0 + L] = cur

    def conv_stage(s_ref, w_ref, b_ref):
        # 3 matmuls (one per kernel row ky), K = 3*cin_pad each, f32 accumulate.
        # No 9-tap im2col materialization.
        cin = s_ref.shape[0]
        cout = w_ref.shape[0]
        acc = jnp.zeros((cout, L), jnp.float32)
        for ky in range(3):
            d = M0 + (ky - 1) * Wp
            rhs = jnp.concatenate(
                [s_ref[:, d - 1: d - 1 + L],
                 s_ref[:, d:     d + L],
                 s_ref[:, d + 1: d + 1 + L]], axis=0)          # (3*cin, L) bf16
            wk = w_ref[:, ky * 3 * cin:(ky + 1) * 3 * cin]      # (cout, 3*cin)
            acc = acc + jnp.dot(wk, rhs, preferred_element_type=jnp.float32)
        return jnp.maximum(acc + b_ref[...], 0.0)               # f32 (cout, L)
        # NOTE: acc is tiny here; with the row-tiling TODO it moves to a
        # pltpu.VMEM f32 accumulator scratch.

    # ---- stage 1: channel concat [x2, x1] == two aligned block copies into
    # the (lane-aligned) interior window; inputs arrive already zero-padded to
    # the (Hp, Wp) grid, the reflect fix-up overwrites the border ring.
    s1_ref[0:C2, M0:M0 + L] = x2_ref[0]
    s1_ref[C2:C2 + C1, M0:M0 + L] = x1_ref[0]
    if cin_pad > C1 + C2:
        # padded channel rows must be exact zeros (stale VMEM may hold NaNs and
        # NaN*0 = NaN even though the weight pad columns are zero). Cheap.
        s1_ref[C1 + C2:cin_pad, :] = jnp.zeros(
            (cin_pad - C1 - C2, s1_ref.shape[1]), s1_ref.dtype)
    reflect_fixup(s1_ref)
    y1 = conv_stage(s1_ref, w1_ref, b1_ref)                     # f32 (cmid_pad, L)

    # ---- stage 2: intermediate stays in VMEM (bf16, == reference's re-quant),
    # reflect-pad it and conv again. All channel rows are written every step.
    s2_ref[:, M0:M0 + L] = y1.astype(s2_ref.dtype)
    reflect_fixup(s2_ref)
    y2 = conv_stage(s2_ref, w2_ref, b2_ref)                     # f32 (cout2_pad, L)

    # lane-dense store of the whole padded grid; the wrapper slices the interior
    o_ref[0] = y2.astype(o_ref.dtype)


def double_conv_fused(x2p, x1p, w1m, b1, w2m, b2, *, H, W, Cout2):
    """x2p: (N,C2,Hp*Wp), x1p: (N,C1,Hp*Wp) zero-padded grids (cat([x2,x1]) order)."""
    N, C2, L = x2p.shape
    C1 = x1p.shape[1]
    cmid_pad = w1m.shape[0]
    cout2_pad = w2m.shape[0]
    cin_pad = w1m.shape[1] // 9
    Hp, Wp = H + 2, W + 2
    assert L == Hp * Wp

    M0 = _round_up(2 * Wp, 128)                   # lane-aligned interior start
    Lm = _round_up(M0 + L + 2 * Wp, 128)          # scratch width (right margin >= 2*Wp)

    col_ids = jnp.tile(jnp.arange(Wp, dtype=jnp.int32), Hp)[None, :]   # (1, L)

    kernel = functools.partial(_fused_double_conv_kernel, H=H, W=W, M0=M0)

    out_flat = pl.pallas_call(
        kernel,
        out_shape=jax.ShapeDtypeStruct((N, cout2_pad, L), jnp.float32),
        grid=(N,),
        in_specs=[
            pl.BlockSpec((1, C2, L), lambda n: (n, 0, 0)),
            pl.BlockSpec((1, C1, L), lambda n: (n, 0, 0)),
            pl.BlockSpec((1, L), lambda n: (0, 0)),
            pl.BlockSpec((cmid_pad, 9 * cin_pad), lambda n: (0, 0)),
            pl.BlockSpec((cmid_pad, 1), lambda n: (0, 0)),
            pl.BlockSpec((cout2_pad, 9 * cmid_pad), lambda n: (0, 0)),
            pl.BlockSpec((cout2_pad, 1), lambda n: (0, 0)),
        ],
        out_specs=pl.BlockSpec((1, cout2_pad, L), lambda n: (n, 0, 0)),
        scratch_shapes=[
            pltpu.VMEM((cin_pad, Lm), ACT_DTYPE),     # padded concat(x2,x1), bf16
            pltpu.VMEM((cmid_pad, Lm), ACT_DTYPE),    # padded conv1 output, bf16
        ],
        compiler_params=pltpu.CompilerParams(
            dimension_semantics=("parallel",),
            # small test tiles need far less; raise (~96 MiB on v5e/v6e) once
            # the row-tiling TODO lands and tiles are sized per generation.
            vmem_limit_bytes=32 * 1024 * 1024,
        ),
    )(x2p, x1p, col_ids, w1m, b1, w2m, b2)

    # wrapper-side layout plumbing: padded flat grid -> NCHW interior
    return out_flat.reshape(N, cout2_pad, Hp, Wp)[:, :Cout2, 1:H + 1, 1:W + 1]


# ---------------------------------------------------------------------------
# XLA glue: gather-free bilinear x2 upsample (align_corners=True) as 2 matmuls
# ---------------------------------------------------------------------------
def _interp_matrix(out_size, in_size):
    if out_size == 1:
        src = jnp.zeros((1,), jnp.float32)
    else:
        src = jnp.arange(out_size, dtype=jnp.float32) * ((in_size - 1) / (out_size - 1))
    lo = jnp.clip(jnp.floor(src).astype(jnp.int32), 0, in_size - 1)
    hi = jnp.minimum(lo + 1, in_size - 1)
    w = src - lo.astype(jnp.float32)
    eye = jnp.eye(in_size, dtype=jnp.float32)
    return (1.0 - w)[:, None] * eye[lo] + w[:, None] * eye[hi]       # (out, in)


def upsample_bilinear_x2_align_corners(x_nchw):
    N, C, H, W = x_nchw.shape
    Ry = _interp_matrix(2 * H, H)
    Rx = _interp_matrix(2 * W, W)
    return jnp.einsum('oh,nchw,pw->ncop', Ry, x_nchw, Rx)


def _prep_weight(w_hwio, cin_pad, cout_pad):
    """HWIO (3,3,Cin,Cout) -> (cout_pad, 9*cin_pad), K ordered (ky, kx, cin)."""
    kh, kw, cin, cout = w_hwio.shape
    w = jnp.transpose(w_hwio, (3, 0, 1, 2))                  # (Cout,3,3,Cin)
    w = jnp.pad(w, ((0, cout_pad - cout), (0, 0), (0, 0), (0, cin_pad - cin)))
    return w.reshape(cout_pad, kh * kw * cin_pad).astype(ACT_DTYPE)


def uptranspose_forward(x1_nchw, x2_nchw, params):
    """Equivalent of uptranspose.forward(x1, x2); inputs/outputs are NCHW f32."""
    x1 = x1_nchw.astype(jnp.float32)
    x2 = x2_nchw.astype(jnp.float32)

    x1 = upsample_bilinear_x2_align_corners(x1)
    diffY = x2.shape[2] - x1.shape[2]
    diffX = x2.shape[3] - x1.shape[3]
    x1 = jnp.pad(x1, ((0, 0), (0, 0),
                      (diffY // 2, diffY - diffY // 2),
                      (diffX // 2, diffX - diffX // 2)))

    N, C2, H, W = x2.shape
    C1 = x1.shape[1]
    assert H >= 2 and W >= 2, "reflect padding needs H, W >= 2"

    Cout1 = params["w1"].shape[-1]
    Cout2 = params["w2"].shape[-1]
    cin_pad = _round_up(C1 + C2, 16)    # bf16 sublane packing
    cmid_pad = _round_up(Cout1, 16)     # bf16 scratch channel dim
    cout2_pad = _round_up(Cout2, 8)     # f32 output channel dim

    Hp, Wp = H + 2, W + 2
    # zero-pad each input to the (Hp, Wp) grid in the wrapper (XLA-fused pads)
    # and flatten: lets the kernel do single aligned block copies; the kernel's
    # reflect fix-up overwrites the zero border ring.  bf16 at the boundary.
    x2p = jnp.pad(x2.astype(ACT_DTYPE),
                  ((0, 0), (0, 0), (1, 1), (1, 1))).reshape(N, C2, Hp * Wp)
    x1p = jnp.pad(x1.astype(ACT_DTYPE),
                  ((0, 0), (0, 0), (1, 1), (1, 1))).reshape(N, C1, Hp * Wp)

    w1m = _prep_weight(params["w1"], cin_pad, cmid_pad)
    w2m = _prep_weight(params["w2"], cmid_pad, cout2_pad)
    b1 = jnp.pad(params["b1"].astype(jnp.float32), (0, cmid_pad - Cout1)).reshape(-1, 1)
    b2 = jnp.pad(params["b2"].astype(jnp.float32), (0, cout2_pad - Cout2)).reshape(-1, 1)

    return double_conv_fused(x2p, x1p, w1m, b1, w2m, b2, H=H, W=W, Cout2=Cout2)


# ---------------------------------------------------------------------------
# Pure-JAX reference (mirrors the kernel's bf16 quantization points)
# ---------------------------------------------------------------------------
def _ref_conv(x_nchw, w_hwio, b):
    xpad = jnp.pad(x_nchw, ((0, 0), (0, 0), (1, 1), (1, 1)), mode="reflect")
    y = lax.conv_general_dilated(xpad, w_hwio, (1, 1), "VALID",
                                 dimension_numbers=("NCHW", "HWIO", "NCHW"))
    return jnp.maximum(y + b[None, :, None, None], 0.0)


def _ref_forward(x1_nchw, x2_nchw, params):
    q = lambda a: a.astype(ACT_DTYPE).astype(jnp.float32)
    x1 = upsample_bilinear_x2_align_corners(x1_nchw.astype(jnp.float32))
    diffY = x2_nchw.shape[2] - x1.shape[2]
    diffX = x2_nchw.shape[3] - x1.shape[3]
    x1 = jnp.pad(x1, ((0, 0), (0, 0),
                      (diffY // 2, diffY - diffY // 2),
                      (diffX // 2, diffX - diffX // 2)))
    x = jnp.concatenate([x2_nchw.astype(jnp.float32), x1], axis=1)
    y = _ref_conv(q(x), q(params["w1"]), params["b1"].astype(jnp.float32))
    y = _ref_conv(q(y), q(params["w2"]), params["b2"].astype(jnp.float32))
    return y


if __name__ == "__main__":
    key = jax.random.PRNGKey(0)
    k1, k2, k3, k4, k5, k6 = jax.random.split(key, 6)

    # x1: decoder feature (low res), x2: skip connection (2x resolution)
    N, C1, C2 = 2, 4, 4
    H1, W1 = 8, 8
    H2, W2 = 16, 16
    in_ch = C1 + C2
    out_ch = 4

    x1 = jax.random.normal(k1, (N, C1, H1, W1), jnp.float32)   # NCHW, like PyTorch
    x2 = jax.random.normal(k2, (N, C2, H2, W2), jnp.float32)

    params = {
        "w1": 0.1 * jax.random.normal(k3, (3, 3, in_ch, out_ch), jnp.float32),
        "b1": 0.1 * jax.random.normal(k4, (out_ch,), jnp.float32),
        "w2": 0.1 * jax.random.normal(k5, (3, 3, out_ch, out_ch), jnp.float32),
        "b2": 0.1 * jax.random.normal(k6, (out_ch,), jnp.float32),
    }

    out = jax.block_until_ready(uptranspose_forward(x1, x2, params))
    assert out.shape == (N, out_ch, H2, W2), out.shape

    ref = jax.block_until_ready(_ref_forward(x1, x2, params))
    max_err = float(jnp.max(jnp.abs(out - ref)))
    assert jnp.allclose(out, ref, rtol=1e-2, atol=1e-2), max_err

    print("KERNEL_OK")
</pallas_src>

<mosaic_0001>
module attributes {stable_mosaic.version = 11 : i64} {
  func.func @_fused_double_conv_kernel(%arg0: i32, %arg1: memref<1x4x324xbf16, #tpu.memory_space<vmem>>, %arg2: memref<1x4x324xbf16, #tpu.memory_space<vmem>>, %arg3: memref<1x324xi32, #tpu.memory_space<vmem>>, %arg4: memref<16x144xbf16, #tpu.memory_space<vmem>>, %arg5: memref<16x1xf32, #tpu.memory_space<vmem>>, %arg6: memref<8x144xbf16, #tpu.memory_space<vmem>>, %arg7: memref<8x1xf32, #tpu.memory_space<vmem>>, %arg8: memref<1x8x324xf32, #tpu.memory_space<vmem>>, %arg9: memref<16x512xbf16, #tpu.memory_space<vmem>>, %arg10: memref<16x512xbf16, #tpu.memory_space<vmem>>) attributes {dimension_semantics = [#tpu.dimension_semantics<parallel>], iteration_bounds = array<i64: 2>, scalar_prefetch = 0 : i64, scratch_operands = 2 : i64, tpu.core_type = #tpu.core_type<tc>, window_params = [{transform_indices = @transform_0, window_bounds = array<i64: 1, 4, 324>}, {transform_indices = @transform_1, window_bounds = array<i64: 1, 4, 324>}, {pipeline_mode = #tpu.pipeline_mode<synchronous>, transform_indices = @transform_2, window_bounds = array<i64: 1, 324>}, {pipeline_mode = #tpu.pipeline_mode<synchronous>, transform_indices = @transform_3, window_bounds = array<i64: 16, 144>}, {pipeline_mode = #tpu.pipeline_mode<synchronous>, transform_indices = @transform_4, window_bounds = array<i64: 16, 1>}, {pipeline_mode = #tpu.pipeline_mode<synchronous>, transform_indices = @transform_5, window_bounds = array<i64: 8, 144>}, {pipeline_mode = #tpu.pipeline_mode<synchronous>, transform_indices = @transform_6, window_bounds = array<i64: 8, 1>}, {transform_indices = @transform_7, window_bounds = array<i64: 1, 8, 324>}]} {
    %0 = tpu.iota {dimensions = array<i32: 1>} : vector<1x324xi32>
    %c0 = arith.constant 0 : index
    %c0_0 = arith.constant 0 : index
    %1 = vector.load %arg3[%c0, %c0_0] : memref<1x324xi32, #tpu.memory_space<vmem>>, vector<1x324xi32>
    %c18_i32 = arith.constant 18 : i32
    %2 = vector.broadcast %c18_i32 : i32 to vector<1x324xi32>
    %3 = arith.cmpi slt, %0, %2 : vector<1x324xi32>
    %c306_i32 = arith.constant 306 : i32
    %4 = vector.broadcast %c306_i32 : i32 to vector<1x324xi32>
    %5 = arith.cmpi sge, %0, %4 : vector<1x324xi32>
    %c0_i32 = arith.constant 0 : i32
    %6 = vector.broadcast %c0_i32 : i32 to vector<1x324xi32>
    %7 = arith.cmpi eq, %1, %6 : vector<1x324xi32>
    %c17_i32 = arith.constant 17 : i32
    %8 = vector.broadcast %c17_i32 : i32 to vector<1x324xi32>
    %9 = arith.cmpi eq, %1, %8 : vector<1x324xi32>
    %c0_1 = arith.constant 0 : index
    %c0_2 = arith.constant 0 : index
    %c0_3 = arith.constant 0 : index
    %10 = vector.load %arg1[%c0_1, %c0_2, %c0_3] : memref<1x4x324xbf16, #tpu.memory_space<vmem>>, vector<1x4x324xbf16>
    %11 = vector.shape_cast %10 : vector<1x4x324xbf16> to vector<4x324xbf16>
    %c0_4 = arith.constant 0 : index
    %c128 = arith.constant 128 : index
    %12 = vector.load %arg9[%c0_4, %c128] : memref<16x512xbf16, #tpu.memory_space<vmem>>, vector<4x324xbf16>
    tpu.vector_store %arg9[%c0_4, %c128], %11 {strides = array<i32>} : memref<16x512xbf16, #tpu.memory_space<vmem>>, vector<4x324xbf16>,
    %c0_5 = arith.constant 0 : index
    %c0_6 = arith.constant 0 : index
    %c0_7 = arith.constant 0 : index
    %13 = vector.load %arg2[%c0_5, %c0_6, %c0_7] : memref<1x4x324xbf16, #tpu.memory_space<vmem>>, vector<1x4x324xbf16>
    %14 = vector.shape_cast %13 : vector<1x4x324xbf16> to vector<4x324xbf16>
    %c4 = arith.constant 4 : index
    %c128_8 = arith.constant 128 : index
    %15 = vector.load %arg9[%c4, %c128_8] : memref<16x512xbf16, #tpu.memory_space<vmem>>, vector<4x324xbf16>
    tpu.vector_store %arg9[%c4, %c128_8], %14 {strides = array<i32>} : memref<16x512xbf16, #tpu.memory_space<vmem>>, vector<4x324xbf16>,
    %cst = arith.constant 0.000000e+00 : bf16
    %16 = vector.broadcast %cst : bf16 to vector<8x512xbf16>
    %c8 = arith.constant 8 : index
    %c0_9 = arith.constant 0 : index
    %17 = vector.load %arg9[%c8, %c0_9] : memref<16x512xbf16, #tpu.memory_space<vmem>>, vector<8x512xbf16>
    tpu.vector_store %arg9[%c8, %c0_9], %16 {strides = array<i32>} : memref<16x512xbf16, #tpu.memory_space<vmem>>, vector<8x512xbf16>,
    %c0_10 = arith.constant 0 : index
    %c128_11 = arith.constant 128 : index
    %18 = vector.load %arg9[%c0_10, %c128_11] : memref<16x512xbf16, #tpu.memory_space<vmem>>, vector<16x324xbf16>
    %c0_12 = arith.constant 0 : index
    %c164 = arith.constant 164 : index
    %19 = vector.load %arg9[%c0_12, %c164] : memref<16x512xbf16, #tpu.memory_space<vmem>>, vector<16x324xbf16>
    %c0_13 = arith.constant 0 : index
    %c92 = arith.constant 92 : index
    %20 = vector.load %arg9[%c0_13, %c92] : memref<16x512xbf16, #tpu.memory_space<vmem>>, vector<16x324xbf16>
    %21 = vector.shape_cast %3 : vector<1x324xi1> to vector<1x324xi1>
    %22 = vector.broadcast %21 : vector<1x324xi1> to vector<16x324xi1>
    %23 = arith.select %22, %19, %18 : vector<16x324xi1>, vector<16x324xbf16>
    %24 = vector.shape_cast %5 : vector<1x324xi1> to vector<1x324xi1>
    %25 = vector.broadcast %24 : vector<1x324xi1> to vector<16x324xi1>
    %26 = arith.select %25, %20, %23 : vector<16x324xi1>, vector<16x324xbf16>
    %c0_14 = arith.constant 0 : index
    %c128_15 = arith.constant 128 : index
    %27 = vector.load %arg9[%c0_14, %c128_15] : memref<16x512xbf16, #tpu.memory_space<vmem>>, vector<16x324xbf16>
    tpu.vector_store %arg9[%c0_14, %c128_15], %26 {strides = array<i32>} : memref<16x512xbf16, #tpu.memory_space<vmem>>, vector<16x324xbf16>,
    %c0_16 = arith.constant 0 : index
    %c128_17 = arith.constant 128 : index
    %28 = vector.load %arg9[%c0_16, %c128_17] : memref<16x512xbf16, #tpu.memory_space<vmem>>, vector<16x324xbf16>
    %c0_18 = arith.constant 0 : index
    %c130 = arith.constant 130 : index
    %29 = vector.load %arg9[%c0_18, %c130] : memref<16x512xbf16, #tpu.memory_space<vmem>>, vector<16x324xbf16>
    %c0_19 = arith.constant 0 : index
    %c126 = arith.constant 126 : index
    %30 = vector.load %arg9[%c0_19, %c126] : memref<16x512xbf16, #tpu.memory_space<vmem>>, vector<16x324xbf16>
    %31 = vector.shape_cast %7 : vector<1x324xi1> to vector<1x324xi1>
    %32 = vector.broadcast %31 : vector<1x324xi1> to vector<16x324xi1>
    %33 = arith.select %32, %29, %28 : vector<16x324xi1>, vector<16x324xbf16>
    %34 = vector.shape_cast %9 : vector<1x324xi1> to vector<1x324xi1>
    %35 = vector.broadcast %34 : vector<1x324xi1> to vector<16x324xi1>
    %36 = arith.select %35, %30, %33 : vector<16x324xi1>, vector<16x324xbf16>
    %c0_20 = arith.constant 0 : index
    %c128_21 = arith.constant 128 : index
    %37 = vector.load %arg9[%c0_20, %c128_21] : memref<16x512xbf16, #tpu.memory_space<vmem>>, vector<16x324xbf16>
    tpu.vector_store %arg9[%c0_20, %c128_21], %36 {strides = array<i32>} : memref<16x512xbf16, #tpu.memory_space<vmem>>, vector<16x324xbf16>,
    %cst_22 = arith.constant 0.000000e+00 : f32
    %38 = vector.broadcast %cst_22 : f32 to vector<16x324xf32>
    %c0_23 = arith.constant 0 : index
    %c109 = arith.constant 109 : index
    %39 = vector.load %arg9[%c0_23, %c109] : memref<16x512xbf16, #tpu.memory_space<vmem>>, vector<16x324xbf16>
    %c0_24 = arith.constant 0 : index
    %c110 = arith.constant 110 : index
    %40 = vector.load %arg9[%c0_24, %c110] : memref<16x512xbf16, #tpu.memory_space<vmem>>, vector<16x324xbf16>
    %c0_25 = arith.constant 0 : index
    %c111 = arith.constant 111 : index
    %41 = vector.load %arg9[%c0_25, %c111] : memref<16x512xbf16, #tpu.memory_space<vmem>>, vector<16x324xbf16>
    %42 = tpu.concatenate %39, %40, %41 in 0 : vector<16x324xbf16>, vector<16x324xbf16>, vector<16x324xbf16> -> vector<48x324xbf16>
    %c0_26 = arith.constant 0 : index
    %c0_27 = arith.constant 0 : index
    %43 = vector.load %arg4[%c0_26, %c0_27] : memref<16x144xbf16, #tpu.memory_space<vmem>>, vector<16x48xbf16>
    %cst_28 = arith.constant dense<0.000000e+00> : vector<16x324xf32>
    %44 = tpu.matmul %43, %42, %cst_28 {dimension_numbers = #tpu.dot_dimension_numbers<[1], [0], [0], [1], [0, 0, 1, 1], [], []>} : vector<16x48xbf16>, vector<48x324xbf16>, vector<16x324xf32> -> vector<16x324xf32>
    %45 = arith.addf %38, %44 : vector<16x324xf32>
    %c0_29 = arith.constant 0 : index
    %c127 = arith.constant 127 : index
    %46 = vector.load %arg9[%c0_29, %c127] : memref<16x512xbf16, #tpu.memory_space<vmem>>, vector<16x324xbf16>
    %c0_30 = arith.constant 0 : index
    %c128_31 = arith.constant 128 : index
    %47 = vector.load %arg9[%c0_30, %c128_31] : memref<16x512xbf16, #tpu.memory_space<vmem>>, vector<16x324xbf16>
    %c0_32 = arith.constant 0 : index
    %c129 = arith.constant 129 : index
    %48 = vector.load %arg9[%c0_32, %c129] : memref<16x512xbf16, #tpu.memory_space<vmem>>, vector<16x324xbf16>
    %49 = tpu.concatenate %46, %47, %48 in 0 : vector<16x324xbf16>, vector<16x324xbf16>, vector<16x324xbf16> -> vector<48x324xbf16>
    %c0_33 = arith.constant 0 : index
    %c48 = arith.constant 48 : index
    %50 = vector.load %arg4[%c0_33, %c48] : memref<16x144xbf16, #tpu.memory_space<vmem>>, vector<16x48xbf16>
    %cst_34 = arith.constant dense<0.000000e+00> : vector<16x324xf32>
    %51 = tpu.matmul %50, %49, %cst_34 {dimension_numbers = #tpu.dot_dimension_numbers<[1], [0], [0], [1], [0, 0, 1, 1], [], []>} : vector<16x48xbf16>, vector<48x324xbf16>, vector<16x324xf32> -> vector<16x324xf32>
    %52 = arith.addf %45, %51 : vector<16x324xf32>
    %c0_35 = arith.constant 0 : index
    %c145 = arith.constant 145 : index
    %53 = vector.load %arg9[%c0_35, %c145] : memref<16x512xbf16, #tpu.memory_space<vmem>>, vector<16x324xbf16>
    %c0_36 = arith.constant 0 : index
    %c146 = arith.constant 146 : index
    %54 = vector.load %arg9[%c0_36, %c146] : memref<16x512xbf16, #tpu.memory_space<vmem>>, vector<16x324xbf16>
    %c0_37 = arith.constant 0 : index
    %c147 = arith.constant 147 : index
    %55 = vector.load %arg9[%c0_37, %c147] : memref<16x512xbf16, #tpu.memory_space<vmem>>, vector<16x324xbf16>
    %56 = tpu.concatenate %53, %54, %55 in 0 : vector<16x324xbf16>, vector<16x324xbf16>, vector<16x324xbf16> -> vector<48x324xbf16>
    %c0_38 = arith.constant 0 : index
    %c96 = arith.constant 96 : index
    %57 = vector.load %arg4[%c0_38, %c96] : memref<16x144xbf16, #tpu.memory_space<vmem>>, vector<16x48xbf16>
    %cst_39 = arith.constant dense<0.000000e+00> : vector<16x324xf32>
    %58 = tpu.matmul %57, %56, %cst_39 {dimension_numbers = #tpu.dot_dimension_numbers<[1], [0], [0], [1], [0, 0, 1, 1], [], []>} : vector<16x48xbf16>, vector<48x324xbf16>, vector<16x324xf32> -> vector<16x324xf32>
    %59 = arith.addf %52, %58 : vector<16x324xf32>
    %c0_40 = arith.constant 0 : index
    %c0_41 = arith.constant 0 : index
    %60 = vector.load %arg5[%c0_40, %c0_41] : memref<16x1xf32, #tpu.memory_space<vmem>>, vector<16x1xf32>
    %61 = vector.broadcast %60 : vector<16x1xf32> to vector<16x324xf32>
    %62 = arith.addf %59, %61 : vector<16x324xf32>
    %cst_42 = arith.constant 0.000000e+00 : f32
    %63 = vector.broadcast %cst_42 : f32 to vector<16x324xf32>
    %64 = arith.maximumf %62, %63 : vector<16x324xf32>
    %65 = arith.truncf %64 : vector<16x324xf32> to vector<16x324xbf16>
    %c0_43 = arith.constant 0 : index
    %c128_44 = arith.constant 128 : index
    %66 = vector.load %arg10[%c0_43, %c128_44] : memref<16x512xbf16, #tpu.memory_space<vmem>>, vector<16x324xbf16>
    tpu.vector_store %arg10[%c0_43, %c128_44], %65 {strides = array<i32>} : memref<16x512xbf16, #tpu.memory_space<vmem>>, vector<16x324xbf16>,
    %c0_45 = arith.constant 0 : index
    %c128_46 = arith.constant 128 : index
    %67 = vector.load %arg10[%c0_45, %c128_46] : memref<16x512xbf16, #tpu.memory_space<vmem>>, vector<16x324xbf16>
    %c0_47 = arith.constant 0 : index
    %c164_48 = arith.constant 164 : index
    %68 = vector.load %arg10[%c0_47, %c164_48] : memref<16x512xbf16, #tpu.memory_space<vmem>>, vector<16x324xbf16>
    %c0_49 = arith.constant 0 : index
    %c92_50 = arith.constant 92 : index
    %69 = vector.load %arg10[%c0_49, %c92_50] : memref<16x512xbf16, #tpu.memory_space<vmem>>, vector<16x324xbf16>
    %70 = vector.shape_cast %3 : vector<1x324xi1> to vector<1x324xi1>
    %71 = vector.broadcast %70 : vector<1x324xi1> to vector<16x324xi1>
    %72 = arith.select %71, %68, %67 : vector<16x324xi1>, vector<16x324xbf16>
    %73 = vector.shape_cast %5 : vector<1x324xi1> to vector<1x324xi1>
    %74 = vector.broadcast %73 : vector<1x324xi1> to vector<16x324xi1>
    %75 = arith.select %74, %69, %72 : vector<16x324xi1>, vector<16x324xbf16>
    %c0_51 = arith.constant 0 : index
    %c128_52 = arith.constant 128 : index
    %76 = vector.load %arg10[%c0_51, %c128_52] : memref<16x512xbf16, #tpu.memory_space<vmem>>, vector<16x324xbf16>
    tpu.vector_store %arg10[%c0_51, %c128_52], %75 {strides = array<i32>} : memref<16x512xbf16, #tpu.memory_space<vmem>>, vector<16x324xbf16>,
    %c0_53 = arith.constant 0 : index
    %c128_54 = arith.constant 128 : index
    %77 = vector.load %arg10[%c0_53, %c128_54] : memref<16x512xbf16, #tpu.memory_space<vmem>>, vector<16x324xbf16>
    %c0_55 = arith.constant 0 : index
    %c130_56 = arith.constant 130 : index
    %78 = vector.load %arg10[%c0_55, %c130_56] : memref<16x512xbf16, #tpu.memory_space<vmem>>, vector<16x324xbf16>
    %c0_57 = arith.constant 0 : index
    %c126_58 = arith.constant 126 : index
    %79 = vector.load %arg10[%c0_57, %c126_58] : memref<16x512xbf16, #tpu.memory_space<vmem>>, vector<16x324xbf16>
    %80 = vector.shape_cast %7 : vector<1x324xi1> to vector<1x324xi1>
    %81 = vector.broadcast %80 : vector<1x324xi1> to vector<16x324xi1>
    %82 = arith.select %81, %78, %77 : vector<16x324xi1>, vector<16x324xbf16>
    %83 = vector.shape_cast %9 : vector<1x324xi1> to vector<1x324xi1>
    %84 = vector.broadcast %83 : vector<1x324xi1> to vector<16x324xi1>
    %85 = arith.select %84, %79, %82 : vector<16x324xi1>, vector<16x324xbf16>
    %c0_59 = arith.constant 0 : index
    %c128_60 = arith.constant 128 : index
    %86 = vector.load %arg10[%c0_59, %c128_60] : memref<16x512xbf16, #tpu.memory_space<vmem>>, vector<16x324xbf16>
    tpu.vector_store %arg10[%c0_59, %c128_60], %85 {strides = array<i32>} : memref<16x512xbf16, #tpu.memory_space<vmem>>, vector<16x324xbf16>,
    %cst_61 = arith.constant 0.000000e+00 : f32
    %87 = vector.broadcast %cst_61 : f32 to vector<8x324xf32>
    %c0_62 = arith.constant 0 : index
    %c109_63 = arith.constant 109 : index
    %88 = vector.load %arg10[%c0_62, %c109_63] : memref<16x512xbf16, #tpu.memory_space<vmem>>, vector<16x324xbf16>
    %c0_64 = arith.constant 0 : index
    %c110_65 = arith.constant 110 : index
    %89 = vector.load %arg10[%c0_64, %c110_65] : memref<16x512xbf16, #tpu.memory_space<vmem>>, vector<16x324xbf16>
    %c0_66 = arith.constant 0 : index
    %c111_67 = arith.constant 111 : index
    %90 = vector.load %arg10[%c0_66, %c111_67] : memref<16x512xbf16, #tpu.memory_space<vmem>>, vector<16x324xbf16>
    %91 = tpu.concatenate %88, %89, %90 in 0 : vector<16x324xbf16>, vector<16x324xbf16>, vector<16x324xbf16> -> vector<48x324xbf16>
    %c0_68 = arith.constant 0 : index
    %c0_69 = arith.constant 0 : index
    %92 = vector.load %arg6[%c0_68, %c0_69] : memref<8x144xbf16, #tpu.memory_space<vmem>>, vector<8x48xbf16>
    %cst_70 = arith.constant dense<0.000000e+00> : vector<8x324xf32>
    %93 = tpu.matmul %92, %91, %cst_70 {dimension_numbers = #tpu.dot_dimension_numbers<[1], [0], [0], [1], [0, 0, 1, 1], [], []>} : vector<8x48xbf16>, vector<48x324xbf16>, vector<8x324xf32> -> vector<8x324xf32>
    %94 = arith.addf %87, %93 : vector<8x324xf32>
    %c0_71 = arith.constant 0 : index
    %c127_72 = arith.constant 127 : index
    %95 = vector.load %arg10[%c0_71, %c127_72] : memref<16x512xbf16, #tpu.memory_space<vmem>>, vector<16x324xbf16>
    %c0_73 = arith.constant 0 : index
    %c128_74 = arith.constant 128 : index
    %96 = vector.load %arg10[%c0_73, %c128_74] : memref<16x512xbf16, #tpu.memory_space<vmem>>, vector<16x324xbf16>
    %c0_75 = arith.constant 0 : index
    %c129_76 = arith.constant 129 : index
    %97 = vector.load %arg10[%c0_75, %c129_76] : memref<16x512xbf16, #tpu.memory_space<vmem>>, vector<16x324xbf16>
    %98 = tpu.concatenate %95, %96, %97 in 0 : vector<16x324xbf16>, vector<16x324xbf16>, vector<16x324xbf16> -> vector<48x324xbf16>
    %c0_77 = arith.constant 0 : index
    %c48_78 = arith.constant 48 : index
    %99 = vector.load %arg6[%c0_77, %c48_78] : memref<8x144xbf16, #tpu.memory_space<vmem>>, vector<8x48xbf16>
    %cst_79 = arith.constant dense<0.000000e+00> : vector<8x324xf32>
    %100 = tpu.matmul %99, %98, %cst_79 {dimension_numbers = #tpu.dot_dimension_numbers<[1], [0], [0], [1], [0, 0, 1, 1], [], []>} : vector<8x48xbf16>, vector<48x324xbf16>, vector<8x324xf32> -> vector<8x324xf32>
    %101 = arith.addf %94, %100 : vector<8x324xf32>
    %c0_80 = arith.constant 0 : index
    %c145_81 = arith.constant 145 : index
    %102 = vector.load %arg10[%c0_80, %c145_81] : memref<16x512xbf16, #tpu.memory_space<vmem>>, vector<16x324xbf16>
    %c0_82 = arith.constant 0 : index
    %c146_83 = arith.constant 146 : index
    %103 = vector.load %arg10[%c0_82, %c146_83] : memref<16x512xbf16, #tpu.memory_space<vmem>>, vector<16x324xbf16>
    %c0_84 = arith.constant 0 : index
    %c147_85 = arith.constant 147 : index
    %104 = vector.load %arg10[%c0_84, %c147_85] : memref<16x512xbf16, #tpu.memory_space<vmem>>, vector<16x324xbf16>
    %105 = tpu.concatenate %102, %103, %104 in 0 : vector<16x324xbf16>, vector<16x324xbf16>, vector<16x324xbf16> -> vector<48x324xbf16>
    %c0_86 = arith.constant 0 : index
    %c96_87 = arith.constant 96 : index
    %106 = vector.load %arg6[%c0_86, %c96_87] : memref<8x144xbf16, #tpu.memory_space<vmem>>, vector<8x48xbf16>
    %cst_88 = arith.constant dense<0.000000e+00> : vector<8x324xf32>
    %107 = tpu.matmul %106, %105, %cst_88 {dimension_numbers = #tpu.dot_dimension_numbers<[1], [0], [0], [1], [0, 0, 1, 1], [], []>} : vector<8x48xbf16>, vector<48x324xbf16>, vector<8x324xf32> -> vector<8x324xf32>
    %108 = arith.addf %101, %107 : vector<8x324xf32>
    %c0_89 = arith.constant 0 : index
    %c0_90 = arith.constant 0 : index
    %109 = vector.load %arg7[%c0_89, %c0_90] : memref<8x1xf32, #tpu.memory_space<vmem>>, vector<8x1xf32>
    %110 = vector.broadcast %109 : vector<8x1xf32> to vector<8x324xf32>
    %111 = arith.addf %108, %110 : vector<8x324xf32>
    %cst_91 = arith.constant 0.000000e+00 : f32
    %112 = vector.broadcast %cst_91 : f32 to vector<8x324xf32>
    %113 = arith.maximumf %111, %112 : vector<8x324xf32>
    %c0_92 = arith.constant 0 : index
    %c0_93 = arith.constant 0 : index
    %c0_94 = arith.constant 0 : index
    %114 = vector.load %arg8[%c0_92, %c0_93, %c0_94] : memref<1x8x324xf32, #tpu.memory_space<vmem>>, vector<1x8x324xf32>
    %115 = vector.shape_cast %114 : vector<1x8x324xf32> to vector<8x324xf32>
    %116 = vector.shape_cast %113 : vector<8x324xf32> to vector<1x8x324xf32>
    tpu.vector_store %arg8[%c0_92, %c0_93, %c0_94], %116 {strides = array<i32>} : memref<1x8x324xf32, #tpu.memory_space<vmem>>, vector<1x8x324xf32>,
    return
  }
  func.func @transform_0(%arg0: i32) -> (i32, i32, i32) {
    %c0_i32 = arith.constant 0 : i32
    %c0_i32_0 = arith.constant 0 : i32
    %c0_i32_1 = arith.constant 0 : i32
    return %arg0, %c0_i32, %c0_i32_0 : i32, i32, i32
  }
  func.func @transform_1(%arg0: i32) -> (i32, i32, i32) {
    %c0_i32 = arith.constant 0 : i32
    %c0_i32_0 = arith.constant 0 : i32
    %c0_i32_1 = arith.constant 0 : i32
    return %arg0, %c0_i32, %c0_i32_0 : i32, i32, i32
  }
  func.func @transform_2(%arg0: i32) -> (i32, i32) {
    %c0_i32 = arith.constant 0 : i32
    %c0_i32_0 = arith.constant 0 : i32
    %c0_i32_1 = arith.constant 0 : i32
    return %c0_i32, %c0_i32_0 : i32, i32
  }
  func.func @transform_3(%arg0: i32) -> (i32, i32) {
    %c0_i32 = arith.constant 0 : i32
    %c0_i32_0 = arith.constant 0 : i32
    %c0_i32_1 = arith.constant 0 : i32
    return %c0_i32, %c0_i32_0 : i32, i32
  }
  func.func @transform_4(%arg0: i32) -> (i32, i32) {
    %c0_i32 = arith.constant 0 : i32
    %c0_i32_0 = arith.constant 0 : i32
    %c0_i32_1 = arith.constant 0 : i32
    return %c0_i32, %c0_i32_0 : i32, i32
  }
  func.func @transform_5(%arg0: i32) -> (i32, i32) {
    %c0_i32 = arith.constant 0 : i32
    %c0_i32_0 = arith.constant 0 : i32
    %c0_i32_1 = arith.constant 0 : i32
    return %c0_i32, %c0_i32_0 : i32, i32
  }
  func.func @transform_6(%arg0: i32) -> (i32, i32) {
    %c0_i32 = arith.constant 0 : i32
    %c0_i32_0 = arith.constant 0 : i32
    %c0_i32_1 = arith.constant 0 : i32
    return %c0_i32, %c0_i32_0 : i32, i32
  }
  func.func @transform_7(%arg0: i32) -> (i32, i32, i32) {
    %c0_i32 = arith.constant 0 : i32
    %c0_i32_0 = arith.constant 0 : i32
    %c0_i32_1 = arith.constant 0 : i32
    return %arg0, %c0_i32, %c0_i32_0 : i32, i32, i32
  }
}

</mosaic_0001>

<bundles_post_ra>
// kernel: tpu_custom_call.1
= control target key start
LH: loop header
LB: loop body
LE: loop exit
PB: predicated region body
PF: predicated region fallthrough
CT: control target
= control target key end

     0   :  { %s2961_s0 = inlined_call_operand.vmem [shape: bf16[2,4,324], index: 0, kind: input, shape index: {}]   ;;  %s2962_s1 = inlined_call_operand.hbm [shape: bf16[2,4,324], index: 1, kind: input, shape index: {}]   ;;  %s2963_s2 = inlined_call_operand.hbm [shape: s32[1,324], index: 2, kind: input, shape index: {}]   ;;  %s2964_s3 = inlined_call_operand.vmem [shape: bf16[16,144], index: 3, kind: input, shape index: {}]   ;;  %s2965_s4 = inlined_call_operand.vmem [shape: f32[16,1], index: 4, kind: input, shape index: {}]   ;;  %s2966_s5 = inlined_call_operand.vmem [shape: bf16[8,144], index: 5, kind: input, shape index: {}]   ;;  %s2967_s6 = inlined_call_operand.vmem [shape: f32[8,1], index: 6, kind: input, shape index: {}]   ;;  %s2968_s7 = inlined_call_operand.hbm [shape: f32[2,8,324], index: 7, kind: output, shape index: {}]  }
   0x1   :  { %2992 = sst [smem:[#allocation13_spill]] %s2963_s2 }
   0x2   :  { %12 = vsyncpa [#allocation5], 0 }
   0x3   :  { %14 = vsyncpa [#allocation5 + $0x1], 0 }
   0x4   :  { %15 = vsyncpa [#allocation8], 0 }
   0x5   :  { %16 = vsyncpa [#allocation6], 0 }
   0x6   :  { %18 = vsyncpa [#allocation6 + $0x1], 0  ;;  %s2220_s24 = smov 0   ;;  %s2222_s25 = smov 0  }
   0x7   :  { %s2224_s26 = smov 0   ;;  %s2226_s27 = smov 0  }
   0x8 LB: > { %s2241_s28 = sadd.s32 4294967295, %s2159_s27   ;;  %s1818_s29 = sadd.s32 4294967294, %s2159_s27   ;;  %s2159_s27 = sphi %s2226_s27, %s3050_s27   ;;  %s2155_s26 = sphi %s2224_s26, %s3049_s26   ;;  %s2151_s25 = sphi %s2222_s25, %s3048_s25   ;;  %s2147_s24 = sphi %s2220_s24, %s3047_s24  }
   0x9   : > { %p70_p0 = scmp.ne.s32.totalorder %s2151_s25, %s2147_s24  ;;  %p2969_p1 = scmp.eq.s32.totalorder %s2241_s28, 0 }
   0xa   : > { %p205_p3 = scmp.eq.s32.totalorder %s1818_s29, 1  ;;  %p1819_p5 = scmp.ge.s32.totalorder %s2159_s27, 1 }
   0xb   : > { %p2250_p4 = por %p2969_p1, %p70_p0  ;;  %p212_p7 = scmp.lt.s32.totalorder %s2159_s27, 3 }
   0xc   : > { %p2255_p6 = por %p205_p3, %p70_p0  ;;  %s2161_s10 = smov [#allocation7]  }
   0xd   : > { %s2993_s30 = scalar_select %p2250_p4, 1, 0 }
   0xe   : > { %s2994_s8 = scalar_select %p2255_p6, 1, 0 }
   0xf   : > { %p2260_p8 = pnand %p1819_p5, %p212_p7  ;;  %s225_s11 = sshll.u32 %s2161_s10, 4  ;;  %s226_s11 = int_to_ptr.vmem [resolvable:$true] %s225_s11 }
  0x10   : > { %s2268_s12 = sadd.s32 1, %s2159_s27   ;;  %s57_s16 = sadd.s32 1, %s2155_s26 }
  0x11   : > { %s2995_s9 = scalar_select %p2260_p8, 1, 0 }
  0x12   : > { %p1955_p10 = pneg %p2260_p8  ;;  %s54_s14 = ssub.s32 %s2159_s27, %s2268_s12 }
  0x13   : > { %p2278_p12 = scmp.eq.s32.totalorder %s54_s14, 0  ;;  %s2998_s2 = sld [smem:[#allocation13_spill]] }
  0x14   : > { %p2272_p11 = pnand %p1955_p10, %p2969_p1 }
  0x15   : > { %s2997_s15 = scalar_select %p2278_p12, 1, 0 }
  0x16   : > { %p2033_p3 = pneg %p2272_p11 }
  0x19   : > { %s2031_s19 = scalar_lea.hbm %s2998_s2, 48 }
  0x1a   : > { %p2032_p0 = scmp.ne.s32.totalorder %s2998_s2, %s2031_s19  ;;  %p2038_p10 = scmp.lt.u32.totalorder %s2031_s19, %s2998_s2 }
  0x1c   : > { %p2034_p5 = pnand %p2033_p3, %p2032_p0 }
  0x1e   : > { %p2035_p7 = pneg %p2034_p5 }
  0x20   : > { %p2040_p9 = pnand %p2038_p10, %p2035_p7 }
  0x22   : > { %2043 = shalt.err (!%p2040_p9)
}
  0x23   : > { %s2044_s29 = scalar_lea.vmem %s226_s11, 48  ;;  %s2051_s10 = scalar_lea.vmem %s226_s11, 64 }
  0x24   : > { %p2045_p1 = scmp.ne.s32.totalorder %s226_s11, %s2044_s29  ;;  %p2052_p6 = scmp.lt.s32.totalorder %s226_s11, %s226_s11 }
  0x25   : > { %p2053_p4 = scmp.lt.s32.totalorder %s2051_s10, %s2044_s29 }
  0x26   : > { %p2047_p2 = pnand %p2045_p1, %p2033_p3 }
  0x27   : > { %p2054_p8 = por %p2053_p4, %p2052_p6 }
  0x28   : > { %p2048_p13 = pneg %p2047_p2 }
  0x2a   : > { %p2055_p12 = pnand %p2054_p8, %p2048_p13 }
  0x2c   : > { %2058 = shalt.err (!%p2055_p12)
}
  0x2d   : > { %1958 = dma.hbm_to_vmem [thread:$0]  (!%p2272_p11), %s2998_s2, 48, %s226_s11, [#allocation8]  }
  0x2e   : > { %p2999_p1 = scmp.ne.s32.totalorder %s2997_s15, 0  ;;  %p65_p2 = scmp.eq.s32.totalorder %s2159_s27, 0 }
  0x2f   : > { %p3000_p4 = scmp.ne.s32.totalorder %s2155_s26, %s2151_s25  ;;  %p3001_p6 = scmp.eq.s32.totalorder %s2241_s28, 1 }
  0x30   : > { %s2304_s18 = scalar_select %p2999_p1, %s2155_s26, %s57_s16  }
  0x31   : > { %p2312_p8 = por %p3001_p6, %p3000_p4  ;;  %p1968_p9 = scmp.lt.s32.totalorder %s2159_s27, 2 }
  0x32   : > { %s256_s19 = sand.u32 1, %s2155_s26   ;;  %p3003_p12 = pmov %p3000_p4 }
  0x33   : > { %s1941_s20 = smul.u32 6, %s256_s19  ;;  %s257_s10 = scalar_lea.sflag [#allocation5], %s256_s19 }
  0x34   : > { %p66_p13 = por %p65_p2, %p3003_p12  ;;  %s1942_s21 = smul.u32 96, %s2159_s27 }
  0x35   : > { %s260_s23 = scalar_lea.vmem [#allocation4], %s1941_s20  ;;  %s2064_s11 = scalar_lea.hbm %s2962_s1, 192 }
  0x36   : > { %p2322_p0 = pnand %p1968_p9, %p66_p13  ;;  %s2329_s16 = scalar_lea.hbm %s2962_s1, %s1942_s21 }
  0x37   : > { %s268_s29 = sshll.u32 %s260_s23, 4  ;;  %s2059_s14 = scalar_lea.hbm %s2329_s16, 96  ;;  %s2331_s29 = int_to_ptr.vmem [resolvable:$true] %s268_s29 }
  0x38   : > { %p2060_p11 = scmp.ne.s32.totalorder %s2329_s16, %s2059_s14  ;;  %p2061_p3 = pneg %p2322_p0 }
  0x39   : > { %p2065_p10 = scmp.lt.u32.totalorder %s2329_s16, %s2962_s1  ;;  %p2066_p1 = scmp.lt.u32.totalorder %s2064_s11, %s2059_s14 }
  0x3a   : > { %p2062_p5 = pnand %p2061_p3, %p2060_p11  ;;  %p2068_p4 = scmp.lt.u32.totalorder %s2059_s14, %s2329_s16 }
  0x3b   : > { %p2067_p2 = por %p2066_p1, %p2065_p10 }
  0x3c   : > { %p2063_p7 = pneg %p2062_p5 }
  0x3d   : > { %p2069_p6 = por %p2068_p4, %p2067_p2 }
  0x3f   : > { %p2070_p9 = pnand %p2069_p6, %p2063_p7 }
  0x41   : > { %2073 = shalt.err (!%p2070_p9)
}
  0x42   : > { %s2074_s19 = scalar_lea.vmem %s2331_s29, 96  ;;  %s2162_s20 = smov [#allocation4]  }
  0x43   : > { %p2075_p12 = scmp.ne.s32.totalorder %s2331_s29, %s2074_s19  ;;  %s2079_s23 = sshll.u32 %s2162_s20, 4  ;;  %s2080_s23 = int_to_ptr.vmem [resolvable:$false] %s2079_s23 }
  0x44   : > { %s2081_s2 = scalar_lea.vmem %s2080_s23, 192  ;;  %p2082_p5 = scmp.lt.s32.totalorder %s2331_s29, %s2080_s23 }
  0x45   : > { %p2077_p13 = pnand %p2075_p12, %p2061_p3  ;;  %p2083_p10 = scmp.lt.s32.totalorder %s2081_s2, %s2074_s19 }
  0x47   : > { %p2078_p11 = pneg %p2077_p13  ;;  %p2084_p1 = por %p2083_p10, %p2082_p5 }
  0x49   : > { %p2085_p2 = pnand %p2084_p1, %p2078_p11 }
  0x4b   : > { %2088 = shalt.err (!%p2085_p2)
}
  0x4c   : > { %1962 = dma.hbm_to_vmem [thread:$0]  (!%p2322_p0), %s2329_s16, 96, %s2331_s29, %s257_s10  }
  0x4d   : > { %p3005_p7 = scmp.ne.s32.totalorder %s2995_s9, 0 }
  0x4e   : > { %s2361_s14 = sand.u32 (!%p3005_p7), 1, %s2151_s25   ;;  %p3006_p3 = scmp.ne.s32.totalorder (!%p3005_p7), %s2993_s30, 0 }
  0x4f   : > { %277 = sbr.rel (%p3005_p7) target bundleno = 2564 (0xa04), region = 48  ;;  %s280_s21 = scalar_lea.sflag (!%p3005_p7), [#allocation5], %s2361_s14 }
  0x50   : > { %s1943_s17 = smul.u32 (!%p3005_p7), 6, %s2361_s14 }
  0x52   : > { %s2365_s11 = scalar_lea.vmem (!%p3005_p7), [#allocation4], %s1943_s17 }
  0x56   : > { %2134 = dma.done.wait (%p3006_p3), %s280_s21, 96  }
  0x57   : > { %2136 = vsyncadd (%p3006_p3), %s280_s21, 4294967200  ;;  %p3007_p0 = scmp.eq.s32.totalorder %s2241_s28, 0 }
  0x59   : > { %2138 = dma.done.wait (%p3007_p0), [#allocation8], 48   ;;  %p3008_p4 = pmov %p3007_p0 }
  0x5a   : > { %v331_v0 = vlaneseq  ;;  %v2163_v1 = vmov 1983009808   ;;  %p323_p6 = scmp.lt.s32.totalorder %s2241_s28, 1  ;;  %v2164_v3 = vmov 0   ;;  %vm2165_vm0 = vmmov 0   ;;  %s2166_s10 = smov 36  }
  0x5b   : > { %2140 = vsyncadd (%p3008_p4), [#allocation8], 4294967248  ;;  %v348_v2 = vunpack.c.l.s4 %v2163_v1  ;;  %394 = vst [vmem:[#allocation2] sm:$0xf0] %v2164_v3  ;;  %800 = vmatprep.mubr.bf16.mxu0 %v2164_v3  ;;  %2020 = vset.pattern.permute.xlu0 %v2164_v3  ;;  %v369_v14 = vld [vmem:[%s2365_s11] sm:$0x3f] }
  0x5c   : > { %395 = vst [vmem:[#allocation2 + $0x8] sm:$0xf0] %v2164_v3  ;;  %396 = vst [vmem:[#allocation2 + $0x10] sm:$0xf0] %v2164_v3  ;;  %v332_v4 = vand.u32 127, %v331_v0  ;;  %v2384_v5 = vshrl.u32 %v331_v0, 7  ;;  %2021 = vset.pattern.permute.xlu1 %v2164_v3  ;;  %v371_v16 = vcombine.low %v369_v14, %v369_v14 }
  0x5d   : > { %397 = vst [vmem:[#allocation2 + $0x18] sm:$0xf0] %v2164_v3  ;;  %vm409_vm1 = vmpackc.low %vm2165_vm0, %vm2165_vm0  ;;  %v349_v6 = vunpack.c.0.s8 %v348_v2  ;;  %s324_s30 = scalar_select %p323_p6, %s2241_s28, 1  ;;  %vm392_vm4 = vcmask 551938   ;;  %vm367_vm5 = vcmask 549888   ;;  %vm430_vm8 = vcmask 293888  }
  0x5e   : > { %v411_v7 = vsel %vm409_vm1, 65537, %v2164_v3  ;;  %vm336_vm2 = vcmp.lt.s32.totalorder %v332_v4, 18  ;;  %v2392_v8 = vsub.s32 0, %v2384_v5  ;;  %v2397_v10 = vsub.s32 4, %v2384_v5  ;;  %s2167_s15 = smov 92   ;;  %s2168_s19 = smov 56  }
  0x5f   : > { %v352_v9 = vsub.s32 %v349_v6, %v2384_v5  ;;  %vm408_vm3 = vmpackc.low %vm2165_vm0, %vm336_vm2  ;;  %s1945_s9 = smul.u32 6, %s324_s30  ;;  %1827 = vst.sshfl [vmem:[#allocation2 + $0x8] sm:$0x30 pattern:$0x76325410] %v371_v16  ;;  %v334_v25 = vadd.s32 256, %v332_v4 }
  0x60   : > { %v410_v11 = vsel %vm408_vm3, 65537, %v2164_v3  ;;  %v423_v12 = vrot.slane %v411_v7, %v2392_v8  ;;  %v470_v29 = vrot.slane %v411_v7, %v2397_v10  ;;  %v335_v45 = vld [vmem:[#allocation7] sm:$0x7]  ;;  %v541_v46 = vsub.s32 1, %v2384_v5  ;;  %s2169_s20 = smov 2   ;;  %s2984_s23 = smov 126  }
  0x61   : > { %v415_v13 = vrot.slane %v410_v11, %v2392_v8  ;;  %s327_s29 = scalar_lea.vmem %s2961_s0, %s1945_s9  ;;  %v385_v17 = vrot.slane %v369_v14, %v352_v9  ;;  %v419_v18 = vrot.slane %v410_v11, %v2397_v10  ;;  %v378_v21 = vrot.slane %v371_v16, %v352_v9  ;;  %s2171_s2 = smov 124  }
  0x62   : > { %v344_v15 = vld [vmem:[%s327_s29] sm:$0x3f]  ;;  %428 = vrot.lane.b32.xlu1 %v423_v12, %s2166_s10  ;;  %vm341_vm6 = vcmp.ge.s32.totalorder %v334_v25, 306  ;;  %vm342_vm12 = vcmp.eq.s32.totalorder %v335_v45, 0  ;;  %v545_v52 = vsub.s32 2, %v2384_v5  ;;  %vm481_vm15 = vcmask 752640  }
  0x63   : > { %424 = vrot.lane.b32.xlu0 %v415_v13, %s2166_s10  ;;  %v346_v19 = vcombine.high %v344_v15, %v344_v15  ;;  %v353_v20 = vrot.slane %v344_v15, %v352_v9  ;;  %1826 = vst.sshfl [vmem:[#allocation2 + $0x8] sm:$0x3 pattern:$0x76325410] %v344_v15  ;;  %393 = vst.msk [vmem:[#allocation2 + $0x18] sm:$0xc] %vm392_vm4, %v385_v17  ;;  %v386_v24 = vcombine.high %v378_v21, %v378_v21 }
  0x64   : > { %vm460_vm7 = vmpackc.low %vm341_vm6, %vm341_vm6  ;;  %v534_v47 = vsel %vm342_vm12, 1, %v2164_v3  ;;  %v2457_v53 = vld [vmem:[#allocation2] sm:$0xff]  ;;  %vm497_vm3 = vcmask 457728   ;;  %vm343_vm12 = vcmp.eq.s32.totalorder %v335_v45, 17  ;;  %s2986_s17 = smov 127   ;;  %s2981_s21 = smov 1  }
  0x65   : > { %v360_v22 = vrot.slane %v346_v19, %v352_v9  ;;  %v361_v23 = vcombine.high %v353_v20, %v353_v20  ;;  %391 = vst [vmem:[#allocation2 + $0x10] sm:$0xc] %v386_v24  ;;  %v462_v30 = vsel %vm460_vm7, 65537, %v2164_v3  ;;  %v538_v50 = vrot.slane %v534_v47, %v2392_v8  ;;  %s2979_s9 = smov 19   ;;  %s2983_s22 = smov 80  }
  0x66   : > { %v474_v31 = vrot.slane %v462_v30, %v2392_v8  ;;  %v542_v51 = vrot.slane %v534_v47, %v541_v46  ;;  %v546_v55 = vrot.slane %v534_v47, %v545_v52  ;;  %v595_v6 = vsel %vm343_vm12, 1, %v2164_v3  ;;  %s2177_s16 = smov 111   ;;  %s2178_s11 = smov 32  }
  0x67   : > { %366 = vst [vmem:[#allocation2 + $0x10] sm:$0x3] %v361_v23  ;;  %426 = vrot.lane.b32.xlu0 %v419_v18, %s2166_s10  ;;  %368 = vst.msk [vmem:[#allocation2 + $0x18] sm:$0x3] %vm367_vm5, %v360_v22  ;;  %vm547_vm13 = vcmp.eq.s32.totalorder %v538_v50, 1  ;;  %v599_v7 = vrot.slane %v595_v6, %v2392_v8  ;;  %v603_v9 = vrot.slane %v595_v6, %v541_v46  ;;  %vm528_vm12 = vcmask 556032  }
  0x68   : > { %vm548_vm14 = vcmp.eq.s32.totalorder %v542_v51, 1  ;;  %vm549_vm4 = vcmp.eq.s32.totalorder %v546_v55, 1  ;;  %v607_v14 = vrot.slane %v595_v6, %v545_v52  ;;  %v2173_v6 = vmov 0.0  }
  0x69   : > { %vm550_vm2 = vmpackc.low %vm548_vm14, %vm547_vm13  ;;  %vm608_vm14 = vcmp.eq.s32.totalorder %v599_v7, 1  ;;  %1873 = vmatprep.subr.bf16.mxu1 %v2173_v6  ;;  %1879 = vmatprep.mubr.msk.bf16.mxu1 %vm2165_vm0, %v2173_v6  ;;  %v2595_v7 = vld [vmem:[%s2964_s3] ss:$8 sps:$4 sm:$0xff]  }
  0x6a   : > { %v2410_v26 = vld [vmem:[#allocation2 + $0x8] sm:$0xff]  ;;  %v552_v62 = vsel %vm550_vm2, 65537, %v2164_v3  ;;  %vm551_vm7 = vmpackc.low %vm549_vm4, %vm549_vm4  ;;  %vm610_vm4 = vcmp.eq.s32.totalorder %v607_v14, 1 }
  0x6b   : > { %439 = vrot.lane.b32.xlu1 %v2410_v26, %s2166_s10  ;;  %v557_v4 = vrot.slane %v552_v62, %v2392_v8  ;;  %v553_v5 = vsel %vm551_vm7, 65537, %v2164_v3  ;;  %vm612_vm7 = vmpackc.low %vm610_vm4, %vm610_vm4 }
  0x6c   : > { %v565_v13 = vrot.slane %v553_v5, %v2392_v8  ;;  %v614_v22 = vsel %vm612_vm7, 65537, %v2164_v3  ;;  %vm2988_vm7 = vcmask 1031168  }
  0x6d   : > { %v626_v25 = vrot.slane %v614_v22, %v2392_v8 }
  0x6e   : > { %v2414_v27 = vld [vmem:[#allocation2 + $0x18] sm:$0xff]  ;;  %v2416_v28 = vld [vmem:[#allocation2 + $0x10] sm:$0xff] }
  0x6f   : > { %441 = vrot.lane.b32.xlu0 %v2416_v28, %s2166_s10  ;;  %443 = vrot.lane.b32.xlu1 %v2414_v27, %s2166_s10 }
  0x73   : > { %477 = vrot.lane.b32.xlu1 %v470_v29, %s2167_s15  ;;  %475 = vrot.lane.b32.xlu0 %v423_v12, %s2167_s15  ;;  %v561_v12 = vrot.slane %v552_v62, %v2397_v10 }
  0x77   : > { %479 = vrot.lane.b32.xlu0 %v474_v31, %s2167_s15 }
  0xd4   : > { %v429_v33 = vpop.permute.xlu1 %428 }
  0xd5   : > { %v2425_v32 = vpop.permute.xlu0 %424 }
  0xd6   : > { %vm433_vm9 = vcmp.ne.s16.totalorder %v2425_v32, 0 }
  0xd9   : > { %v427_v34 = vpop.permute.xlu0 %426 }
  0xda   : > { %v2433_v37 = vsel %vm430_vm8, %v2425_v32, %v427_v34  ;;  %v2436_v38 = vsel %vm430_vm8, %v427_v34, %v429_v33 }
  0xdb   : > { %vm434_vm10 = vcmp.ne.s16.totalorder %v2433_v37, 0  ;;  %vm435_vm11 = vcmp.ne.s16.totalorder %v2436_v38, 0 }
  0xdd   : > { %v440_v35 = vpop.permute.xlu1 %439 }
  0xde   : > { %v450_v36 = vsel %vm433_vm9, %v2410_v26, %v440_v35 }
  0xdf   : > { %491 = vrot.lane.b32.xlu1 %v450_v36, %s2168_s19 }
  0xe1   : > { %v442_v39 = vpop.permute.xlu0 %441  ;;  %v444_v40 = vpop.permute.xlu1 %443 }
  0xe2   : > { %v445_v41 = vsel %vm430_vm8, %v440_v35, %v442_v39  ;;  %v446_v42 = vsel %vm430_vm8, %v442_v39, %v444_v40 }
  0xe3   : > { %v451_v43 = vsel %vm434_vm10, %v2416_v28, %v445_v41  ;;  %v452_v44 = vsel %vm435_vm11, %v2414_v27, %v446_v42 }
  0xe4   : > { %493 = vrot.lane.b32.xlu0 %v451_v43, %s2168_s19  ;;  %495 = vrot.lane.b32.xlu1 %v452_v44, %s2168_s19 }
  0xe5   : > { %v2453_v48 = vpop.permute.xlu0 %475  ;;  %v478_v49 = vpop.permute.xlu1 %477 }
  0xe6   : > { %vm484_vm1 = vcmp.ne.s16.totalorder %v2453_v48, 0  ;;  %v2467_v58 = vsel %vm481_vm15, %v2453_v48, %v478_v49 }
  0xe7   : > { %vm485_vm5 = vcmp.ne.s16.totalorder %v2467_v58, 0 }
  0xe9   : > { %v2459_v54 = vpop.permute.xlu0 %479 }
  0xea   : > { %v2470_v59 = vsel %vm481_vm15, %v478_v49, %v2459_v54  ;;  %vm2976_vm13 = vcmp.ne.s16.totalorder %v2459_v54, 0  ;;  %vm609_vm15 = vcmp.eq.s32.totalorder %v603_v9, 1 }
  0xeb   : > { %vm2974_vm6 = vcmp.ne.s16.totalorder %v2470_v59, 0  ;;  %vm611_vm2 = vmpackc.low %vm609_vm15, %vm608_vm14  ;;  %vm572_vm14 = vcmask 15360  }
  0xec   : > { %v613_v16 = vsel %vm611_vm2, 65537, %v2164_v3 }
  0xed   : > { %v618_v21 = vrot.slane %v613_v16, %v2392_v8 }
 0x151   : > { %v492_v56 = vpop.permute.xlu1 %491 }
 0x152   : > { %v504_v57 = vsel %vm484_vm1, %v2457_v53, %v492_v56 }
 0x153   : > { %512 = vrot.lane.b32.xlu0 %v504_v57, %s2166_s10 }
 0x156   : > { %v494_v60 = vpop.permute.xlu0 %493  ;;  %v496_v61 = vpop.permute.xlu1 %495 }
 0x157   : > { %v498_v63 = vsel %vm497_vm3, %v492_v56, %v494_v60  ;;  %v499_v0 = vsel %vm497_vm3, %v494_v60, %v496_v61  ;;  %v507_v11 = vsel %vm2976_vm13, %v2414_v27, %v496_v61  ;;  %v622_v27 = vrot.slane %v613_v16, %v2397_v10 }
 0x158   : > { %v505_v1 = vsel %vm485_vm5, %v2410_v26, %v498_v63  ;;  %v506_v2 = vsel %vm2974_vm6, %v2416_v28, %v499_v0 }
 0x159   : > { %514 = vrot.lane.b32.xlu1 %v505_v1, %s2166_s10  ;;  %516 = vrot.lane.b32.xlu0 %v506_v2, %s2166_s10 }
 0x15d   : > { %518 = vrot.lane.b32.xlu1 %v507_v11, %s2166_s10  ;;  %566 = vrot.lane.b32.xlu0 %v557_v4, %s2169_s20 }
 0x161   : > { %568 = vrot.lane.b32.xlu1 %v561_v12, %s2169_s20  ;;  %570 = vrot.lane.b32.xlu0 %v565_v13, %s2169_s20 }
 0x1c5   : > { %v513_v15 = vpop.permute.xlu0 %512 }
 0x1cb   : > { %v517_v17 = vpop.permute.xlu0 %516  ;;  %v515_v18 = vpop.permute.xlu1 %514 }
 0x1cc   : > { %v520_v19 = vsel %vm430_vm8, %v513_v15, %v515_v18  ;;  %v521_v20 = vsel %vm430_vm8, %v515_v18, %v517_v17 }
 0x1cd   : > { %581 = vrot.lane.b32.xlu1 %v520_v19, %s2169_s20  ;;  %583 = vrot.lane.b32.xlu0 %v521_v20, %s2169_s20 }
 0x1cf   : > { %v519_v23 = vpop.permute.xlu1 %518  ;;  %v2514_v28 = vpop.permute.xlu0 %566 }
 0x1d0   : > { %v522_v24 = vsel %vm430_vm8, %v517_v17, %v519_v23  ;;  %vm2973_vm15 = vcmp.ne.s16.totalorder %v2514_v28, 0 }
 0x1d1   : > { %529 = vst.msk [vmem:[#allocation2 + $0x18] sm:$0xff] %vm528_vm12, %v522_v24  ;;  %627 = vrot.lane.b32.xlu0 %v618_v21, %s2984_s23 }
 0x1d3   : > { %v569_v29 = vpop.permute.xlu1 %568  ;;  %v571_v30 = vpop.permute.xlu0 %570 }
 0x1d4   : > { %v2518_v31 = vsel %vm572_vm14, %v2514_v28, %v569_v29  ;;  %v2530_v36 = vsel %vm572_vm14, %v569_v29, %v571_v30 }
 0x1d5   : > { %631 = vrot.lane.b32.xlu0 %v626_v25, %s2984_s23  ;;  %vm2972_vm2 = vcmp.ne.s16.totalorder %v2518_v31, 0  ;;  %vm2975_vm4 = vcmp.ne.s16.totalorder %v2530_v36, 0 }
 0x1d8   : > { %v532_v26 = vld [vmem:[#allocation2 + $0x18] sm:$0xff] }
 0x1d9   : > { %585 = vrot.lane.b32.xlu1 %v532_v26, %s2169_s20 }
 0x1dd   : > { %629 = vrot.lane.b32.xlu1 %v622_v27, %s2984_s23 }
 0x23f   : > { %v582_v8 = vpop.permute.xlu1 %581  ;;  %v584_v33 = vpop.permute.xlu0 %583 }
 0x240   : > { %v587_v34 = vsel %vm572_vm14, %v582_v8, %v584_v33  ;;  %v592_v10 = vsel %vm2973_vm15, %v520_v19, %v582_v8  ;;  %vm649_vm15 = vcmask 1014784  }
 0x241   : > { %643 = vrot.lane.b32.xlu1 %v592_v10, %s2171_s2  ;;  %v593_v35 = vsel %vm2972_vm2, %v521_v20, %v587_v34  ;;  %v2025_v34 = vld [vmem:[%s2964_s3 + $0x4] ss:$8 sps:$4 sm:$0xff]   ;;  %v2027_v10 = vld [vmem:[%s2964_s3] ss:$8 sps:$4 sm:$0xff]  }
 0x242   : > { %645 = vrot.lane.b32.xlu0 %v593_v35, %s2171_s2  ;;  %v1126_v35 = vld [vmem:[%s2965_s4 + $0x8] sm:$0xff] }
 0x243   : > { %v2537_v42 = vpop.permute.xlu0 %627 }
 0x244   : > { %vm636_vm2 = vcmp.ne.s16.totalorder %v2537_v42, 0 }
 0x247   : > { %v2539_v44 = vpop.permute.xlu0 %631 }
 0x24b   : > { %v586_v39 = vpop.permute.xlu1 %585 }
 0x24c   : > { %v588_v40 = vsel %vm572_vm14, %v584_v33, %v586_v39  ;;  %v1125_v39 = vld [vmem:[%s2965_s4] sm:$0xff] }
 0x24d   : > { %v594_v41 = vsel %vm2975_vm4, %v532_v26, %v588_v40  ;;  %vm2978_vm4 = vcmp.ne.s16.totalorder %v2539_v44, 0 }
 0x24e   : > { %647 = vrot.lane.b32.xlu1 %v594_v41, %s2171_s2 }
 0x24f   : > { %v630_v43 = vpop.permute.xlu1 %629 }
 0x250   : > { %v2543_v45 = vsel %vm2988_vm7, %v2537_v42, %v630_v43  ;;  %v2557_v52 = vsel %vm2988_vm7, %v630_v43, %v2539_v44 }
 0x251   : > { %vm637_vm6 = vcmp.ne.s16.totalorder %v2543_v45, 0  ;;  %vm2977_vm13 = vcmp.ne.s16.totalorder %v2557_v52, 0 }
 0x2b3   : > { %v644_v46 = vpop.permute.xlu1 %643 }
 0x2b4   : > { %v646_v47 = vpop.permute.xlu0 %645  ;;  %v656_v49 = vsel %vm636_vm2, %v2457_v53, %v644_v46 }
 0x2b5   : > { %v650_v50 = vsel %vm649_vm15, %v644_v46, %v646_v47  ;;  %664 = vrot.lane.b32.xlu0 %v656_v49, %s2169_s20 }
 0x2b6   : > { %v657_v51 = vsel %vm637_vm6, %v520_v19, %v650_v50 }
 0x2b7   : > { %666 = vrot.lane.b32.xlu1 %v657_v51, %s2169_s20 }
 0x2c0   : > { %v648_v55 = vpop.permute.xlu1 %647 }
 0x2c1   : > { %v651_v56 = vsel %vm649_vm15, %v646_v47, %v648_v55  ;;  %v659_v57 = vsel %vm2978_vm4, %v532_v26, %v648_v55  ;;  %vm2990_vm4 = vcmask 7168  }
 0x2c2   : > { %v658_v60 = vsel %vm2977_vm13, %v521_v20, %v651_v56  ;;  %670 = vrot.lane.b32.xlu1 %v659_v57, %s2169_s20  ;;  %vm2989_vm13 = vcmask 1039360  }
 0x2c3   : > { %668 = vrot.lane.b32.xlu0 %v658_v60, %s2169_s20 }
 0x327   : > { %v665_v61 = vpop.permute.xlu0 %664 }
 0x329   : > { %v667_v62 = vpop.permute.xlu1 %666 }
 0x32a   : > { %v2569_v63 = vsel %vm572_vm14, %v665_v61, %v667_v62 }
 0x32b   : > { %678 = vst [vmem:[#allocation2 + $0x8] sm:$0xff] %v2569_v63  ;;  %691 = vrot.lane.b32.xlu0 %v2569_v63, %s2986_s17 }
 0x334   : > { %v671_v0 = vpop.permute.xlu1 %670 }
 0x335   : > { %v669_v1 = vpop.permute.xlu0 %668 }
 0x336   : > { %v673_v2 = vsel %vm572_vm14, %v667_v62, %v669_v1  ;;  %v674_v4 = vsel %vm572_vm14, %v669_v1, %v671_v0 }
 0x337   : > { %679 = vst [vmem:[#allocation2 + $0x10] sm:$0xff] %v673_v2  ;;  %680 = vst.msk [vmem:[#allocation2 + $0x18] sm:$0xff] %vm528_vm12, %v674_v4  ;;  %693 = vrot.lane.b32.xlu1 %v673_v2, %s2986_s17 }
 0x33b   : > { %703 = vrot.lane.b32.xlu1 %v2569_v63, %s2984_s23 }
 0x33e   : > { %v684_v5 = vld [vmem:[#allocation2 + $0x18] sm:$0xff] }
 0x33f   : > { %695 = vrot.lane.b32.xlu0 %v684_v5, %s2986_s17  ;;  %707 = vrot.lane.b32.xlu1 %v684_v5, %s2984_s23 }
 0x343   : > { %705 = vrot.lane.b32.xlu0 %v673_v2, %s2984_s23  ;;  %701 = vrot.lane.b32.xlu1 %v2457_v53, %s2984_s23 }
 0x347   : > { %689 = vrot.lane.b32.xlu0 %v2457_v53, %s2986_s17  ;;  %721 = vrot.lane.b32.xlu1 %v2457_v53, %s2981_s21  ;;  %s3019_s17 = smov 1  }
 0x34b   : > { %852 = vrot.lane.b32.xlu0 %v2457_v53, %s2979_s9  ;;  %719 = vrot.lane.b32.xlu1 %v2595_v7, %s2983_s22 }
 0x34f   : > { %723 = vrot.lane.b32.xlu0 %v2569_v63, %s2981_s21  ;;  %725 = vrot.lane.b32.xlu1 %v673_v2, %s2981_s21 }
 0x353   : > { %727 = vrot.lane.b32.xlu0 %v684_v5, %s2981_s21  ;;  %856 = vrot.lane.b32.xlu1 %v673_v2, %s2979_s9 }
 0x357   : > { %854 = vrot.lane.b32.xlu0 %v2569_v63, %s2979_s9  ;;  %1000 = vrot.lane.b32.xlu1 %v673_v2, %s2177_s16 }
 0x35b   : > { %858 = vrot.lane.b32.xlu0 %v684_v5, %s2979_s9 }
 0x35f   : > { %1002 = vrot.lane.b32.xlu0 %v684_v5, %s2177_s16 }
 0x39d   : > { %v692_v53 = vpop.permute.xlu0 %691 }
 0x39e   : > { %729 = vrot.lane.b32.xlu1 %v692_v53, %s2981_s21 }
 0x3a9   : > { %v694_v9 = vpop.permute.xlu1 %693 }
 0x3aa   : > { %v699_v17 = vsel %vm2989_vm13, %v692_v53, %v694_v9 }
 0x3ad   : > { %v704_v11 = vpop.permute.xlu1 %703 }
 0x3ae   : > { %737 = vrot.lane.b32.xlu1 %v704_v11, %s2981_s21 }
 0x3b1   : > { %v696_v12 = vpop.permute.xlu0 %695  ;;  %v708_v13 = vpop.permute.xlu1 %707 }
 0x3b2   : > { %735 = vrot.lane.b32.xlu0 %v696_v12, %s2981_s21  ;;  %866 = vrot.lane.b32.xlu1 %v696_v12, %s2979_s9  ;;  %v700_v19 = vsel %vm2989_vm13, %v694_v9, %v696_v12 }
 0x3b5   : > { %v706_v14 = vpop.permute.xlu0 %705  ;;  %v702_v15 = vpop.permute.xlu1 %701 }
 0x3b6   : > { %743 = vrot.lane.b32.xlu0 %v708_v13, %s2981_s21  ;;  %874 = vrot.lane.b32.xlu1 %v708_v13, %s2979_s9  ;;  %v710_v21 = vsel %vm2988_vm7, %v704_v11, %v706_v14  ;;  %v711_v23 = vsel %vm2988_vm7, %v706_v14, %v708_v13  ;;  %v709_v33 = vsel %vm2988_vm7, %v702_v15, %v704_v11  ;;  %vm2991_vm7 = vcmask 154624  }
 0x3b9   : > { %v690_v16 = vpop.permute.xlu0 %689  ;;  %v722_v18 = vpop.permute.xlu1 %721 }
 0x3ba   : > { %731 = vrot.lane.b32.xlu0 %v699_v17, %s2981_s21  ;;  %733 = vrot.lane.b32.xlu1 %v700_v19, %s2981_s21  ;;  %v698_v30 = vsel %vm2989_vm13, %v690_v16, %v692_v53  ;;  %vm764_vm13 = vcmask 392192  }
 0x3bd   : > { %v2621_v20 = vpop.permute.xlu0 %852  ;;  %v2624_v22 = vpop.permute.xlu1 %719 }
 0x3be   : > { %739 = vrot.lane.b32.xlu0 %v710_v21, %s2981_s21  ;;  %741 = vrot.lane.b32.xlu1 %v711_v23, %s2981_s21  ;;  %s3020_s21 = smov 19  }
 0x3c1   : > { %v724_v24 = vpop.permute.xlu0 %723  ;;  %v726_v25 = vpop.permute.xlu1 %725 }
 0x3c2   : > { %864 = vrot.lane.b32.xlu0 %v700_v19, %s2979_s9  ;;  %998 = vrot.lane.b32.xlu1 %v2569_v63, %s2177_s16  ;;  %v747_v26 = vsel %vm2990_vm4, %v724_v24, %v726_v25  ;;  %v746_v27 = vsel %vm2990_vm4, %v722_v18, %v724_v24 }
 0x3c3   : > { %768 = vmatprep.subr.bf16.mxu0 %v747_v26 }
 0x3c4   : > { %769 = vmatpush1.bf16.msra.mxu0 %v746_v27 }
 0x3c5   : > { %v728_v29 = vpop.permute.xlu0 %727  ;;  %v857_v40 = vpop.permute.xlu1 %856 }
 0x3c6   : > { %860 = vrot.lane.b32.xlu0 %v698_v30, %s2979_s9  ;;  %v748_v8 = vsel %vm2990_vm4, %v726_v25, %v728_v29  ;;  %862 = vrot.lane.b32.xlu1 %v699_v17, %s2979_s9 }
 0x3c7   : > { %1874 = vmatpush3.bf16.msra.mxu1 %v748_v8 }
 0x3c8   : > { %1875 = vmatprep.subr.bf16.mxu1 %v2173_v6 }
 0x3c9   : > { %v855_v41 = vpop.permute.xlu0 %854  ;;  %v2663_v43 = vpop.permute.xlu1 %1000 }
 0x3ca   : > { %872 = vrot.lane.b32.xlu0 %v711_v23, %s2979_s9  ;;  %870 = vrot.lane.b32.xlu1 %v710_v21, %s2979_s9  ;;  %v878_v9 = vsel %vm2991_vm7, %v855_v41, %v857_v40  ;;  %v877_v14 = vsel %vm2991_vm7, %v2621_v20, %v855_v41 }
 0x3cd   : > { %v859_v46 = vpop.permute.xlu0 %858 }
 0x3ce   : > { %868 = vrot.lane.b32.xlu0 %v709_v33, %s2979_s9  ;;  %1008 = vrot.lane.b32.xlu1 %v696_v12, %s2177_s16 }
 0x3d1   : > { %v1003_v49 = vpop.permute.xlu0 %1002 }
 0x3d2   : > { %1006 = vrot.lane.b32.xlu0 %v700_v19, %s2177_s16  ;;  %1012 = vrot.lane.b32.xlu1 %v711_v23, %s2177_s16 }
 0x3d6   : > { %1004 = vrot.lane.b32.xlu0 %v699_v17, %s2177_s16  ;;  %1010 = vrot.lane.b32.xlu1 %v710_v21, %s2177_s16 }
 0x3da   : > { %1014 = vrot.lane.b32.xlu0 %v708_v13, %s2177_s16  ;;  %994 = vrot.lane.b32.xlu1 %v2025_v34, %s2178_s11  ;;  %v879_v13 = vsel %vm2991_vm7, %v857_v40, %v859_v46 }
 0x3de   : > { %992 = vrot.lane.b32.xlu0 %v2027_v10, %s2178_s11  ;;  %1134 = vperm.xlu1 %2021, %v1126_v35  }
 0x3e2   : > { %1129 = vperm.xlu0 %2020, %v1125_v39  }
 0x410   : > { %v730_v47 = vpop.permute.xlu1 %729 }
 0x420   : > { %v738_v50 = vpop.permute.xlu1 %737 }
 0x424   : > { %v736_v51 = vpop.permute.xlu0 %735  ;;  %v867_v55 = vpop.permute.xlu1 %866 }
 0x428   : > { %v744_v56 = vpop.permute.xlu0 %743  ;;  %v875_v57 = vpop.permute.xlu1 %874 }
 0x42c   : > { %v732_v60 = vpop.permute.xlu0 %731  ;;  %v734_v61 = vpop.permute.xlu1 %733 }
 0x42d   : > { %v750_v62 = vsel %vm2990_vm4, %v732_v60, %v734_v61  ;;  %v751_v63 = vsel %vm2990_vm4, %v734_v61, %v736_v51  ;;  %v749_v0 = vsel %vm2990_vm4, %v730_v47, %v732_v60 }
 0x42e   : > { %770 = vmatprep.subr.bf16.mxu0 %v750_v62  ;;  %1876 = vmatpush3.bf16.msra.mxu1 %v751_v63 }
 0x42f   : > { %771 = vmatpush1.bf16.msra.mxu0 %v749_v0  ;;  %1877 = vmatprep.subr.bf16.mxu1 %v2173_v6 }
 0x430   : > { %v740_v1 = vpop.permute.xlu0 %739  ;;  %v742_v2 = vpop.permute.xlu1 %741 }
 0x431   : > { %v753_v4 = vsel %vm2990_vm4, %v740_v1, %v742_v2  ;;  %v754_v5 = vsel %vm2990_vm4, %v742_v2, %v744_v56  ;;  %v752_v53 = vsel %vm2990_vm4, %v738_v50, %v740_v1  ;;  %vm1016_vm4 = vcmask 908288  }
 0x432   : > { %772 = vmatprep.subr.bf16.mxu0 %v753_v4  ;;  %1878 = vmatpush3.bf16.msra.mxu1 %v754_v5  ;;  %v1018_v27 = vsel %vm1016_vm4, %v2663_v43, %v1003_v49 }
 0x433   : > { %773 = vmatpush1.bf16.msra.mxu0 %v752_v53  ;;  %1883 = vmatprep.subr.bf16.mxu1 %v2173_v6 }
 0x434   : > { %v865_v11 = vpop.permute.xlu0 %864  ;;  %v999_v12 = vpop.permute.xlu1 %998  ;;  %898 = vmatprep.subr.bf16.mxu0 %v878_v9 }
 0x435   : > { %1880 = vmatmul.mubr.msk.bf16.vlgmr.msra.gmra.mrb[0].mxu1 %vm764_vm13, %v2624_v22  ;;  %v882_v17 = vsel %vm2991_vm7, %v865_v11, %v867_v55  ;;  %v1017_v8 = vsel %vm1016_vm4, %v999_v12, %v2663_v43 }
 0x436   : > { %1829 = vmatmul.mubr.msk.bf16.vlgmr.msra.gmra.mrb[0].mxu0 %vm764_vm13, %v2624_v22  ;;  %1884 = vmatpush3.bf16.msra.mxu1 %v879_v13 }
 0x437   : > { %899 = vmatpush1.bf16.msra.mxu0 %v877_v14  ;;  %1885 = vmatprep.subr.bf16.mxu1 %v2173_v6 }
 0x438   : > { %v861_v15 = vpop.permute.xlu0 %860  ;;  %v863_v16 = vpop.permute.xlu1 %862  ;;  %1889 = vmatprep.mubr.msk.bf16.mxu1 %vm2165_vm0, %v2173_v6  ;;  %930 = vmatprep.mubr.bf16.mxu0 %v2164_v3 }
 0x439   : > { %v880_v18 = vsel %vm2991_vm7, %v861_v15, %v863_v16  ;;  %v881_v19 = vsel %vm2991_vm7, %v863_v16, %v865_v11 }
 0x43a   : > { %900 = vmatprep.subr.bf16.mxu0 %v881_v19  ;;  %1886 = vmatpush3.bf16.msra.mxu1 %v882_v17 }
 0x43b   : > { %901 = vmatpush1.bf16.msra.mxu0 %v880_v18  ;;  %1887 = vmatprep.subr.bf16.mxu1 %v2173_v6 }
 0x43c   : > { %v873_v20 = vpop.permute.xlu0 %872  ;;  %v871_v21 = vpop.permute.xlu1 %870 }
 0x43d   : > { %v885_v22 = vsel %vm2991_vm7, %v873_v20, %v875_v57  ;;  %v884_v23 = vsel %vm2991_vm7, %v871_v21, %v873_v20 }
 0x43e   : > { %902 = vmatprep.subr.bf16.mxu0 %v884_v23  ;;  %1888 = vmatpush3.bf16.msra.mxu1 %v885_v22 }
 0x43f   : > { %1893 = vmatprep.subr.bf16.mxu1 %v2173_v6 }
 0x440   : > { %v869_v24 = vpop.permute.xlu0 %868  ;;  %v1009_v25 = vpop.permute.xlu1 %1008 }
 0x441   : > { %v883_v26 = vsel %vm2991_vm7, %v869_v24, %v871_v21  ;;  %1890 = vmatmul.mubr.msk.bf16.vlgmr.msra.gmra.mrb[4].mxu1 %vm764_vm13, %v2595_v7  ;;  %vm996_vm7 = vcmask 261120  }
 0x442   : > { %903 = vmatpush1.bf16.msra.mxu0 %v883_v26  ;;  %1894 = vmatpush3.bf16.msra.mxu1 %v1003_v49 }
 0x443   : > { %1035 = vmatprep.subr.bf16.mxu0 %v1018_v27  ;;  %1895 = vmatprep.subr.bf16.mxu1 %v2173_v6 }
 0x444   : > { %v1007_v29 = vpop.permute.xlu0 %1006  ;;  %v1013_v30 = vpop.permute.xlu1 %1012  ;;  %1899 = vmatprep.mubr.msk.bf16.mxu1 %vm2165_vm0, %v2173_v6 }
 0x445   : > { %1831 = vmatmul.mubr.msk.bf16.vlgmr.msra.gmra.mrb[0].mxu0 %vm764_vm13, %v2595_v7  ;;  %v1020_v33 = vsel %vm1016_vm4, %v1007_v29, %v1009_v25 }
 0x446   : > { %1036 = vmatpush1.bf16.msra.mxu0 %v1017_v8  ;;  %1896 = vmatpush3.bf16.msra.mxu1 %v1009_v25 }
 0x447   : > { %1037 = vmatprep.subr.bf16.mxu0 %v1020_v33  ;;  %1897 = vmatprep.subr.bf16.mxu1 %v2173_v6 }
 0x448   : > { %v1005_v34 = vpop.permute.xlu0 %1004  ;;  %1067 = vmatprep.mubr.bf16.mxu0 %v2164_v3  ;;  %v1011_v35 = vpop.permute.xlu1 %1010 }
 0x449   : > { %v1019_v10 = vsel %vm1016_vm4, %v1005_v34, %v1007_v29  ;;  %v1021_v7 = vsel %vm1016_vm4, %v1011_v35, %v1013_v30 }
 0x44a   : > { %1038 = vmatpush1.bf16.msra.mxu0 %v1019_v10 }
 0x44c   : > { %v1015_v39 = vpop.permute.xlu0 %1014  ;;  %v995_v41 = vpop.permute.xlu1 %994 }
 0x44d   : > { %v1022_v40 = vsel %vm1016_vm4, %v1013_v30, %v1015_v39  ;;  %1898 = vmatpush3.bf16.msra.mxu1 %v1015_v39 }
 0x44e   : > { %1039 = vmatprep.subr.bf16.mxu0 %v1022_v40  ;;  %1903 = vmatprep.subr.bf16.mxu1 %v2173_v6 }
 0x44f   : > { %1040 = vmatpush1.bf16.msra.mxu0 %v1021_v7 }
 0x450   : > { %v993_v43 = vpop.permute.xlu0 %992 }
 0x451   : > { %v997_v46 = vsel %vm996_vm7, %v993_v43, %v995_v41  ;;  %v2732_v43 = vld [vmem:[#allocation3] sm:$0xff] }
 0x452   : > { %1835 = vmatmul.mubr.msk.bf16.vlgmr.msra.gmra.mrb[0].mxu0 %vm764_vm13, %v997_v46  ;;  %1900 = vmatmul.mubr.msk.bf16.vlgmr.msra.gmra.mrb[8].mxu1 %vm764_vm13, %v997_v46 }
 0x453   : > { %1909 = vmatprep.mubr.msk.bf16.mxu1 %vm2165_vm0, %v2173_v6  ;;  %1390 = vmatprep.mubr.bf16.mxu0 %v2164_v3 }
 0x45d   : > { %v1135_v0 = vpop.permute.xlu1 %1134 }
 0x461   : > { %v1130_v63 = vpop.permute.xlu0 %1129 }
 0x508   : > { %v845_v47 = vpop.f32.mrb[0].mxu1 }
 0x509   : > { %v1881_v49 = vpop.f32.mrb[1].mxu1 }
 0x50a   : > { %v848_v50 = vpop.f32.mrb[2].mxu1 }
 0x50b   : > { %v1882_v51 = vpop.f32.mrb[3].mxu1 }
 0x514   : > { %v975_v55 = vpop.f32.mrb[4].mxu1 }
 0x515   : > { %v976_v56 = vadd.f32 %v975_v55, %v845_v47  ;;  %v1891_v57 = vpop.f32.mrb[5].mxu1 }
 0x516   : > { %v978_v60 = vpop.f32.mrb[6].mxu1 }
 0x517   : > { %v979_v61 = vadd.f32 %v978_v60, %v848_v50  ;;  %v1892_v62 = vpop.f32.mrb[7].mxu1 }
 0x525   : > { %v1069_v1 = vpop.f32.mrb[0].mxu0  ;;  %v1112_v2 = vpop.f32.mrb[8].mxu1 }
 0x526   : > { %v1121_v4 = vadd.f32 %v1112_v2, %v976_v56  ;;  %v1137_v5 = vadd.f32 %v1130_v63, %v1069_v1  ;;  %v1071_v53 = vpop.f32.mrb[1].mxu0  ;;  %v1901_v9 = vpop.f32.mrb[9].mxu1 }
 0x527   : > { %v1138_v11 = vadd.f32 %v1130_v63, %v1071_v53  ;;  %v1073_v12 = vpop.f32.mrb[2].mxu0  ;;  %v1115_v13 = vpop.f32.mrb[10].mxu1 }
 0x528   : > { %v1139_v14 = vadd.f32 %v1130_v63, %v1121_v4  ;;  %v1140_v15 = vadd.f32 %v1135_v0, %v1073_v12  ;;  %v1124_v16 = vadd.f32 %v1115_v13, %v979_v61  ;;  %v1075_v17 = vpop.f32.mrb[3].mxu0  ;;  %v1902_v18 = vpop.f32.mrb[11].mxu1  ;;  %v1143_v20 = vmax.f32 %v1137_v5, 0.0 }
 0x529   : > { %v1141_v19 = vadd.f32 %v1135_v0, %v1075_v17  ;;  %v1144_v23 = vmax.f32 %v1138_v11, 0.0 }
 0x52a   : > { %v1146_v21 = vmax.f32 %v1140_v15, 0.0  ;;  %v1142_v22 = vadd.f32 %v1135_v0, %v1124_v16  ;;  %v1145_v25 = vmax.f32 %v1139_v14, 0.0 }
 0x52b   : > { %v1147_v24 = vmax.f32 %v1141_v19, 0.0 }
 0x52c   : > { %v1149_v26 = vpack.c.bf16 %v1146_v21, %v1143_v20  ;;  %v1148_v27 = vmax.f32 %v1142_v22, 0.0  ;;  %v2794_v20 = vld [vmem:[%s2966_s5] sm:$0xf] }
 0x52d   : > { %v1150_v29 = vpack.c.bf16 %v1147_v24, %v1144_v23  ;;  %v1837_v21 = vcombine.low %v2794_v20, %v2794_v20 }
 0x52e   : > { %v1151_v30 = vpack.c.bf16 %v1148_v27, %v1145_v25  ;;  %1162 = vrot.lane.b32.xlu1 %v1149_v26, %s2166_s10 }
 0x52f   : > { %1164 = vrot.lane.b32.xlu0 %v1150_v29, %s2166_s10 }
 0x530   : > { %1154 = vst.msk [vmem:[#allocation3 + $0x18] sm:$0xff] %vm528_vm12, %v1151_v30 }
 0x537   : > { %v1157_v8 = vld [vmem:[#allocation3 + $0x18] sm:$0xff] }
 0x538   : > { %1166 = vrot.lane.b32.xlu1 %v1157_v8, %s2166_s10 }
 0x5a0   : > { %v1163_v33 = vpop.permute.xlu1 %1162 }
 0x5a1   : > { %v1165_v34 = vpop.permute.xlu0 %1164  ;;  %v1173_v10 = vsel %vm433_vm9, %v1149_v26, %v1163_v33  ;;  %vm3009_vm9 = vcmp.ne.s16.totalorder %v2459_v54, 0 }
 0x5a2   : > { %v1168_v35 = vsel %vm430_vm8, %v1163_v33, %v1165_v34  ;;  %1179 = vrot.lane.b32.xlu0 %v1173_v10, %s2168_s19 }
 0x5a3   : > { %v1174_v39 = vsel %vm434_vm10, %v1150_v29, %v1168_v35  ;;  %vm3010_vm10 = vcmp.ne.s16.totalorder %v2470_v59, 0 }
 0x5a4   : > { %1181 = vrot.lane.b32.xlu1 %v1174_v39, %s2168_s19 }
 0x5aa   : > { %v1167_v40 = vpop.permute.xlu1 %1166 }
 0x5ab   : > { %v1169_v7 = vsel %vm430_vm8, %v1165_v34, %v1167_v40 }
 0x5ac   : > { %v1175_v41 = vsel %vm435_vm11, %v1157_v8, %v1169_v7  ;;  %vm3011_vm11 = vcmp.ne.s16.totalorder %v2514_v28, 0 }
 0x5ad   : > { %1183 = vrot.lane.b32.xlu0 %v1175_v41, %s2168_s19  ;;  %s3017_s19 = smov 126  }
 0x614   : > { %v1180_v32 = vpop.permute.xlu0 %1179 }
 0x615   : > { %v1191_v46 = vsel %vm484_vm1, %v2732_v43, %v1180_v32  ;;  %vm3012_vm1 = vcmp.ne.s16.totalorder %v2518_v31, 0 }
 0x616   : > { %1199 = vrot.lane.b32.xlu1 %v1191_v46, %s2166_s10  ;;  %v1182_v37 = vpop.permute.xlu1 %1181 }
 0x617   : > { %v1185_v47 = vsel %vm497_vm3, %v1180_v32, %v1182_v37 }
 0x618   : > { %v1192_v49 = vsel %vm485_vm5, %v1149_v26, %v1185_v47  ;;  %vm3015_vm5 = vcmp.ne.s16.totalorder %v2557_v52, 0 }
 0x619   : > { %1201 = vrot.lane.b32.xlu0 %v1192_v49, %s2166_s10 }
 0x61f   : > { %v1184_v38 = vpop.permute.xlu0 %1183 }
 0x620   : > { %v1186_v50 = vsel %vm497_vm3, %v1182_v37, %v1184_v38  ;;  %v1194_v51 = vsel %vm3009_vm9, %v1157_v8, %v1184_v38  ;;  %vm3014_vm3 = vcmp.ne.s16.totalorder %v2539_v44, 0  ;;  %vm3025_vm9 = vcmask 7168   ;;  %v1565_v38 = vld [vmem:[%s2966_s5] sm:$0xff] }
 0x621   : > { %v1193_v48 = vsel %vm3010_vm10, %v1150_v29, %v1186_v50  ;;  %1205 = vrot.lane.b32.xlu0 %v1194_v51, %s2166_s10  ;;  %vm3026_vm10 = vmmov %vm3025_vm9  ;;  %v1842_v50 = vcombine.low %v1565_v38, %v1565_v38  ;;  %v1696_v51 = vld [vmem:[%s2967_s6] sm:$0xff] }
 0x622   : > { %1203 = vrot.lane.b32.xlu1 %v1193_v48, %s2166_s10  ;;  %s3016_s10 = smov 127   ;;  %v1843_v48 = vcombine.high %v1565_v38, %v1565_v38 }
 0x688   : > { %v1200_v55 = vpop.permute.xlu1 %1199 }
 0x68b   : > { %v1202_v56 = vpop.permute.xlu0 %1201 }
 0x68c   : > { %v1207_v58 = vsel %vm430_vm8, %v1200_v55, %v1202_v56 }
 0x68d   : > { %1223 = vrot.lane.b32.xlu1 %v1207_v58, %s2169_s20 }
 0x693   : > { %v1206_v57 = vpop.permute.xlu0 %1205 }
 0x694   : > { %v1204_v60 = vpop.permute.xlu1 %1203 }
 0x695   : > { %v1208_v61 = vsel %vm430_vm8, %v1202_v56, %v1204_v60  ;;  %v1209_v54 = vsel %vm430_vm8, %v1204_v60, %v1206_v57  ;;  %vm3013_vm8 = vcmp.ne.s16.totalorder %v2530_v36, 0 }
 0x696   : > { %1215 = vst.msk [vmem:[#allocation3 + $0x18] sm:$0xff] %vm528_vm12, %v1209_v54  ;;  %1225 = vrot.lane.b32.xlu0 %v1208_v61, %s2169_s20 }
 0x69d   : > { %v1218_v59 = vld [vmem:[#allocation3 + $0x18] sm:$0xff] }
 0x69e   : > { %1227 = vrot.lane.b32.xlu1 %v1218_v59, %s2169_s20 }
 0x6ff   : > { %v1224_v62 = vpop.permute.xlu1 %1223 }
 0x700   : > { %v1234_v63 = vsel %vm3011_vm11, %v1207_v58, %v1224_v62  ;;  %vm3027_vm11 = vmmov %vm3025_vm9 }
 0x701   : > { %1240 = vrot.lane.b32.xlu0 %v1234_v63, %s2171_s2 }
 0x708   : > { %v1226_v0 = vpop.permute.xlu0 %1225 }
 0x709   : > { %v1229_v1 = vsel %vm572_vm14, %v1224_v62, %v1226_v0 }
 0x70a   : > { %v1235_v2 = vsel %vm3012_vm1, %v1208_v61, %v1229_v1 }
 0x70b   : > { %1242 = vrot.lane.b32.xlu1 %v1235_v2, %s2171_s2 }
 0x710   : > { %v1228_v4 = vpop.permute.xlu1 %1227 }
 0x711   : > { %v1230_v5 = vsel %vm572_vm14, %v1226_v0, %v1228_v4 }
 0x712   : > { %v1236_v53 = vsel %vm3013_vm8, %v1218_v59, %v1230_v5 }
 0x713   : > { %1244 = vrot.lane.b32.xlu0 %v1236_v53, %s2171_s2  ;;  %s3018_s2 = smov 80  }
 0x773   : > { %v1241_v28 = vpop.permute.xlu0 %1240 }
 0x774   : > { %v1252_v9 = vsel %vm636_vm2, %v2732_v43, %v1241_v28 }
 0x775   : > { %1260 = vrot.lane.b32.xlu1 %v1252_v9, %s2169_s20 }
 0x77d   : > { %v1243_v11 = vpop.permute.xlu1 %1242 }
 0x77e   : > { %v1246_v31 = vsel %vm649_vm15, %v1241_v28, %v1243_v11 }
 0x77f   : > { %v1253_v12 = vsel %vm637_vm6, %v1207_v58, %v1246_v31  ;;  %vm3021_vm6 = vcmask 1039360  }
 0x780   : > { %1262 = vrot.lane.b32.xlu0 %v1253_v12, %s2169_s20  ;;  %vm3028_vm1 = vmmov %vm3021_vm6 }
 0x785   : > { %v1245_v13 = vpop.permute.xlu0 %1244 }
 0x786   : > { %v1247_v36 = vsel %vm649_vm15, %v1243_v11, %v1245_v13  ;;  %v1255_v14 = vsel %vm3014_vm3, %v1218_v59, %v1245_v13  ;;  %vm3023_vm15 = vcmask 1031168   ;;  %vm3030_vm3 = vmmov %vm3025_vm9 }
 0x787   : > { %v1254_v42 = vsel %vm3015_vm5, %v1208_v61, %v1247_v36  ;;  %1266 = vrot.lane.b32.xlu0 %v1255_v14, %s2169_s20  ;;  %vm3024_vm2 = vmmov %vm3023_vm15 }
 0x788   : > { %1264 = vrot.lane.b32.xlu1 %v1254_v42, %s2169_s20  ;;  %vm3029_vm8 = vmmov %vm3024_vm2 }
 0x789   : > { %vm3031_vm5 = vmmov %vm3030_vm3 }
 0x7e7   : > { %v1261_v15 = vpop.permute.xlu1 %1260 }
 0x7f2   : > { %v1263_v16 = vpop.permute.xlu0 %1262 }
 0x7f3   : > { %v1268_v45 = vsel %vm572_vm14, %v1261_v15, %v1263_v16 }
 0x7f4   : > { %1287 = vrot.lane.b32.xlu1 %v1268_v45, %s3016_s10 }
 0x7f9   : > { %v1267_v17 = vpop.permute.xlu0 %1266 }
 0x7fa   : > { %v1265_v18 = vpop.permute.xlu1 %1264 }
 0x7fb   : > { %v1269_v19 = vsel %vm572_vm14, %v1263_v16, %v1265_v18  ;;  %v1270_v44 = vsel %vm572_vm14, %v1265_v18, %v1267_v17  ;;  %vm3022_vm14 = vmmov %vm3021_vm6 }
 0x7fc   : > { %1276 = vst.msk [vmem:[#allocation3 + $0x18] sm:$0xff] %vm528_vm12, %v1270_v44  ;;  %1289 = vrot.lane.b32.xlu0 %v1269_v19, %s3016_s10 }
 0x800   : > { %1298 = vrot.lane.b32.xlu0 %v1268_v45, %s3017_s19 }
 0x803   : > { %v1280_v52 = vld [vmem:[#allocation3 + $0x18] sm:$0xff] }
 0x804   : > { %1291 = vrot.lane.b32.xlu1 %v1280_v52, %s3016_s10  ;;  %1302 = vrot.lane.b32.xlu0 %v1280_v52, %s3017_s19 }
 0x808   : > { %1300 = vrot.lane.b32.xlu1 %v1269_v19, %s3017_s19  ;;  %1296 = vrot.lane.b32.xlu0 %v2732_v43, %s3017_s19 }
 0x80c   : > { %1285 = vrot.lane.b32.xlu1 %v2732_v43, %s3016_s10  ;;  %1311 = vrot.lane.b32.xlu0 %v1837_v21, %s3018_s2 }
 0x810   : > { %1313 = vrot.lane.b32.xlu1 %v2732_v43, %s3019_s17  ;;  %1317 = vrot.lane.b32.xlu0 %v1269_v19, %s3019_s17 }
 0x814   : > { %1439 = vrot.lane.b32.xlu1 %v2732_v43, %s3020_s21  ;;  %1319 = vrot.lane.b32.xlu0 %v1280_v52, %s3019_s17 }
 0x818   : > { %1315 = vrot.lane.b32.xlu1 %v1268_v45, %s3019_s17  ;;  %1443 = vrot.lane.b32.xlu0 %v1269_v19, %s3020_s21 }
 0x81c   : > { %1441 = vrot.lane.b32.xlu1 %v1268_v45, %s3020_s21  ;;  %1578 = vrot.lane.b32.xlu0 %v1269_v19, %s2177_s16 }
 0x820   : > { %1445 = vrot.lane.b32.xlu1 %v1280_v52, %s3020_s21 }
 0x866   : > { %v1288_v22 = vpop.permute.xlu1 %1287 }
 0x867   : > { %1321 = vrot.lane.b32.xlu1 %v1288_v22, %s3019_s17 }
 0x86e   : > { %v1290_v23 = vpop.permute.xlu0 %1289 }
 0x86f   : > { %v1294_v30 = vsel %vm3021_vm6, %v1288_v22, %v1290_v23  ;;  %vm3032_vm6 = vmmov %vm3030_vm3 }
 0x872   : > { %v1299_v24 = vpop.permute.xlu0 %1298 }
 0x873   : > { %1329 = vrot.lane.b32.xlu1 %v1299_v24, %s3019_s17 }
 0x876   : > { %v1292_v25 = vpop.permute.xlu1 %1291  ;;  %v1303_v26 = vpop.permute.xlu0 %1302 }
 0x877   : > { %1327 = vrot.lane.b32.xlu0 %v1292_v25, %s3019_s17  ;;  %1453 = vrot.lane.b32.xlu1 %v1292_v25, %s3020_s21  ;;  %v1295_v33 = vsel %vm3022_vm14, %v1290_v23, %v1292_v25  ;;  %vm3033_vm14 = vmmov %vm3030_vm3 }
 0x87a   : > { %v1301_v27 = vpop.permute.xlu1 %1300  ;;  %v1297_v29 = vpop.permute.xlu0 %1296 }
 0x87b   : > { %1335 = vrot.lane.b32.xlu0 %v1303_v26, %s3019_s17  ;;  %1461 = vrot.lane.b32.xlu1 %v1303_v26, %s3020_s21  ;;  %v1305_v10 = vsel %vm3023_vm15, %v1299_v24, %v1301_v27  ;;  %v1306_v7 = vsel %vm3024_vm2, %v1301_v27, %v1303_v26  ;;  %v1304_v49 = vsel %vm3029_vm8, %v1297_v29, %v1299_v24  ;;  %vm3034_vm15 = vmmov %vm3030_vm3 }
 0x87c   : > { %vm3035_vm2 = vmmov %vm3030_vm3 }
 0x87e   : > { %v1286_v8 = vpop.permute.xlu1 %1285  ;;  %v2823_v34 = vpop.permute.xlu0 %1311 }
 0x87f   : > { %1325 = vrot.lane.b32.xlu0 %v1295_v33, %s3019_s17  ;;  %1323 = vrot.lane.b32.xlu1 %v1294_v30, %s3019_s17  ;;  %v1293_v47 = vsel %vm3028_vm1, %v1286_v8, %v1288_v22 }
 0x882   : > { %v1314_v35 = vpop.permute.xlu1 %1313  ;;  %v1318_v39 = vpop.permute.xlu0 %1317 }
 0x883   : > { %1576 = vrot.lane.b32.xlu0 %v1268_v45, %s2177_s16  ;;  %1331 = vrot.lane.b32.xlu1 %v1305_v10, %s3019_s17 }
 0x886   : > { %v2830_v40 = vpop.permute.xlu1 %1439  ;;  %v1320_v41 = vpop.permute.xlu0 %1319 }
 0x887   : > { %1333 = vrot.lane.b32.xlu0 %v1306_v7, %s3019_s17  ;;  %v1339_v43 = vsel %vm3025_vm9, %v1318_v39, %v1320_v41  ;;  %1580 = vrot.lane.b32.xlu1 %v1280_v52, %s2177_s16  ;;  %vm3036_vm9 = vcmask 154624   ;;  %s2179_s17 = smov [#allocation9]  }
 0x888   : > { %1904 = vmatpush3.bf16.msra.mxu1 %v1339_v43  ;;  %vm3039_vm1 = vmmov %vm3036_vm9 }
 0x889   : > { %1905 = vmatprep.subr.bf16.mxu1 %v2173_v6  ;;  %vm3040_vm8 = vmmov %vm3039_vm1 }
 0x88a   : > { %v1316_v32 = vpop.permute.xlu1 %1315  ;;  %v1444_v58 = vpop.permute.xlu0 %1443 }
 0x88b   : > { %v1337_v46 = vsel %vm3026_vm10, %v1314_v35, %v1316_v32  ;;  %1449 = vrot.lane.b32.xlu0 %v1294_v30, %s3020_s21  ;;  %v1338_v37 = vsel %vm3027_vm11, %v1316_v32, %v1318_v39  ;;  %1451 = vrot.lane.b32.xlu1 %v1295_v33, %s3020_s21  ;;  %vm3037_vm10 = vmmov %vm3036_vm9 }
 0x88c   : > { %1358 = vmatprep.subr.bf16.mxu0 %v1338_v37  ;;  %vm3038_vm11 = vmmov %vm3036_vm9 }
 0x88d   : > { %1359 = vmatpush1.bf16.msra.mxu0 %v1337_v46 }
 0x88e   : > { %v1442_v55 = vpop.permute.xlu1 %1441  ;;  %v2861_v60 = vpop.permute.xlu0 %1578 }
 0x88f   : > { %1447 = vrot.lane.b32.xlu0 %v1293_v47, %s3020_s21  ;;  %1459 = vrot.lane.b32.xlu1 %v1306_v7, %s3020_s21  ;;  %v1464_v36 = vsel %vm3036_vm9, %v1442_v55, %v1444_v58  ;;  %v1463_v16 = vsel %vm3038_vm11, %v2830_v40, %v1442_v55 }
 0x892   : > { %v1446_v56 = vpop.permute.xlu1 %1445 }
 0x893   : > { %1457 = vrot.lane.b32.xlu0 %v1305_v10, %s3020_s21  ;;  %1584 = vrot.lane.b32.xlu1 %v1295_v33, %s2177_s16  ;;  %v1465_v15 = vsel %vm3037_vm10, %v1444_v58, %v1446_v56 }
 0x897   : > { %1455 = vrot.lane.b32.xlu0 %v1304_v49, %s3020_s21  ;;  %1582 = vrot.lane.b32.xlu1 %v1294_v30, %s2177_s16  ;;  %s2093_s21 = sshll.u32 %s2179_s17, 4  ;;  %s2094_s21 = int_to_ptr.vmem [resolvable:$false] %s2093_s21 }
 0x898   : > { %s2095_s9 = scalar_lea.vmem %s2094_s21, 768 }
 0x89b   : > { %1586 = vrot.lane.b32.xlu0 %v1292_v25, %s2177_s16  ;;  %1592 = vrot.lane.b32.xlu1 %v1303_v26, %s2177_s16 }
 0x89f   : > { %1590 = vrot.lane.b32.xlu0 %v1306_v7, %s2177_s16  ;;  %1571 = vrot.lane.b32.xlu1 %v1842_v50, %s2178_s11 }
 0x8a3   : > { %1588 = vrot.lane.b32.xlu0 %v1305_v10, %s2177_s16  ;;  %1699 = vperm.xlu1 %2021, %v1696_v51   ;;  %s1944_s16 = smul.u32 24, %s2361_s14 }
 0x8a5   : > { %s322_s30 = scalar_lea.vmem [#allocation9], %s1944_s16 }
 0x8a6   : > { %s1726_s10 = sshll.u32 %s322_s30, 4  ;;  %s2918_s10 = int_to_ptr.vmem [resolvable:$true] %s1726_s10 }
 0x8a7   : > { %1573 = vrot.lane.b32.xlu0 %v1843_v48, %s2178_s11  ;;  %s1946_s11 = smul.u32 384, %s2241_s28  ;;  %s1712_s28 = scalar_lea.sflag [#allocation6], %s2361_s14 }
 0x8a8   : > { %s2089_s2 = scalar_lea.vmem %s2918_s10, 384  ;;  %p2096_p11 = scmp.lt.s32.totalorder %s2918_s10, %s2094_s21 }
 0x8a9   : > { %s2916_s23 = scalar_lea.hbm %s2968_s7, %s1946_s11  ;;  %p2090_p9 = scmp.ne.s32.totalorder %s2918_s10, %s2089_s2 }
 0x8aa   : > { %p2097_p5 = scmp.lt.s32.totalorder %s2095_s9, %s2089_s2 }
 0x8ab   : > { %p2091_p12 = pnand %p2090_p9, %p2312_p8 }
 0x8ac   : > { %p2098_p10 = por %p2097_p5, %p2096_p11 }
 0x8ad   : > { %p2092_p13 = pneg %p2091_p12 }
 0x8af   : > { %p2099_p1 = pnand %p2098_p10, %p2092_p13 }
 0x8d9   : > { %v1322_v57 = vpop.permute.xlu1 %1321 }
 0x8e5   : > { %v1330_v61 = vpop.permute.xlu1 %1329 }
 0x8e9   : > { %v1328_v54 = vpop.permute.xlu0 %1327  ;;  %v1454_v59 = vpop.permute.xlu1 %1453 }
 0x8ed   : > { %v1336_v62 = vpop.permute.xlu0 %1335  ;;  %v1462_v63 = vpop.permute.xlu1 %1461 }
 0x8f1   : > { %v1326_v0 = vpop.permute.xlu0 %1325  ;;  %v1324_v1 = vpop.permute.xlu1 %1323 }
 0x8f2   : > { %v1342_v2 = vsel %vm3030_vm3, %v1326_v0, %v1328_v54  ;;  %v1340_v4 = vsel %vm3031_vm5, %v1322_v57, %v1324_v1  ;;  %v1341_v5 = vsel %vm3032_vm6, %v1324_v1, %v1326_v0  ;;  %vm3041_vm3 = vmmov %vm3039_vm1 }
 0x8f3   : > { %1906 = vmatpush3.bf16.msra.mxu1 %v1342_v2  ;;  %1360 = vmatprep.subr.bf16.mxu0 %v1341_v5  ;;  %vm3042_vm5 = vmmov %vm3039_vm1 }
 0x8f4   : > { %1361 = vmatpush1.bf16.msra.mxu0 %v1340_v4  ;;  %1907 = vmatprep.subr.bf16.mxu1 %v2173_v6  ;;  %vm3043_vm6 = vmmov %vm3039_vm1 }
 0x8f5   : > { %v1577_v53 = vpop.permute.xlu0 %1576  ;;  %v1332_v28 = vpop.permute.xlu1 %1331 }
 0x8f6   : > { %v1343_v13 = vsel %vm3035_vm2, %v1330_v61, %v1332_v28  ;;  %v1594_v30 = vsel %vm1016_vm4, %v1577_v53, %v2861_v60 }
 0x8f9   : > { %v1334_v9 = vpop.permute.xlu0 %1333  ;;  %v1581_v11 = vpop.permute.xlu1 %1580 }
 0x8fa   : > { %v1345_v31 = vsel %vm3033_vm14, %v1334_v9, %v1336_v62  ;;  %v1344_v12 = vsel %vm3034_vm15, %v1332_v28, %v1334_v9  ;;  %vm3044_vm14 = vmmov %vm3039_vm1  ;;  %v1595_v26 = vsel %vm1016_vm4, %v2861_v60, %v1581_v11 }
 0x8fb   : > { %1362 = vmatprep.subr.bf16.mxu0 %v1344_v12  ;;  %1908 = vmatpush3.bf16.msra.mxu1 %v1345_v31 }
 0x8fc   : > { %1363 = vmatpush1.bf16.msra.mxu0 %v1343_v13  ;;  %1913 = vmatprep.subr.bf16.mxu1 %v2173_v6 }
 0x8fd   : > { %v1450_v14 = vpop.permute.xlu0 %1449  ;;  %1484 = vmatprep.subr.bf16.mxu0 %v1464_v36  ;;  %v1452_v42 = vpop.permute.xlu1 %1451 }
 0x8fe   : > { %1910 = vmatmul.mubr.msk.bf16.vlgmr.msra.gmra.mrb[12].mxu1 %vm764_vm13, %v2823_v34  ;;  %v1467_v45 = vsel %vm3039_vm1, %v1450_v14, %v1452_v42  ;;  %v1468_v44 = vsel %vm3041_vm3, %v1452_v42, %v1454_v59 }
 0x8ff   : > { %1838 = vmatmul.mubr.msk.bf16.vlgmr.msra.gmra.mrb[4].mxu0 %vm764_vm13, %v2823_v34  ;;  %1914 = vmatpush3.bf16.msra.mxu1 %v1465_v15 }
 0x900   : > { %1485 = vmatpush1.bf16.msra.mxu0 %v1463_v16  ;;  %1915 = vmatprep.subr.bf16.mxu1 %v2173_v6 }
 0x901   : > { %v1448_v17 = vpop.permute.xlu0 %1447  ;;  %1486 = vmatprep.subr.bf16.mxu0 %v1467_v45  ;;  %v1460_v18 = vpop.permute.xlu1 %1459  ;;  %1919 = vmatprep.mubr.msk.bf16.mxu1 %vm2165_vm0, %v2173_v6 }
 0x902   : > { %v1466_v19 = vsel %vm3040_vm8, %v1448_v17, %v1450_v14  ;;  %1516 = vmatprep.mubr.bf16.mxu0 %v2164_v3  ;;  %v1471_v22 = vsel %vm3042_vm5, %v1460_v18, %v1462_v63 }
 0x903   : > { %1916 = vmatpush3.bf16.msra.mxu1 %v1468_v44 }
 0x904   : > { %1487 = vmatpush1.bf16.msra.mxu0 %v1466_v19  ;;  %1917 = vmatprep.subr.bf16.mxu1 %v2173_v6 }
 0x905   : > { %v1458_v52 = vpop.permute.xlu0 %1457  ;;  %v1585_v21 = vpop.permute.xlu1 %1584 }
 0x906   : > { %v1470_v23 = vsel %vm3043_vm6, %v1458_v52, %v1460_v18 }
 0x907   : > { %1488 = vmatprep.subr.bf16.mxu0 %v1470_v23  ;;  %1918 = vmatpush3.bf16.msra.mxu1 %v1471_v22 }
 0x908   : > { %1923 = vmatprep.subr.bf16.mxu1 %v2173_v6 }
 0x909   : > { %v1456_v24 = vpop.permute.xlu0 %1455  ;;  %v1583_v27 = vpop.permute.xlu1 %1582 }
 0x90a   : > { %v1469_v25 = vsel %vm3044_vm14, %v1456_v24, %v1458_v52  ;;  %1920 = vmatmul.mubr.msk.bf16.vlgmr.msra.gmra.mrb[16].mxu1 %vm764_vm13, %v2794_v20  ;;  %v1596_v10 = vsel %vm1016_vm4, %v1583_v27, %v1585_v21 }
 0x90b   : > { %1489 = vmatpush1.bf16.msra.mxu0 %v1469_v25  ;;  %1924 = vmatpush3.bf16.msra.mxu1 %v1581_v11 }
 0x90c   : > { %1612 = vmatprep.subr.bf16.mxu0 %v1595_v26  ;;  %1925 = vmatprep.subr.bf16.mxu1 %v2173_v6 }
 0x90d   : > { %v1587_v29 = vpop.permute.xlu0 %1586  ;;  %1929 = vmatprep.mubr.msk.bf16.mxu1 %vm2165_vm0, %v2173_v6  ;;  %v1593_v34 = vpop.permute.xlu1 %1592 }
 0x90e   : > { %1840 = vmatmul.mubr.msk.bf16.vlgmr.msra.gmra.mrb[8].mxu0 %vm764_vm13, %v2794_v20  ;;  %v1597_v8 = vsel %vm1016_vm4, %v1585_v21, %v1587_v29 }
 0x90f   : > { %1613 = vmatpush1.bf16.msra.mxu0 %v1594_v30  ;;  %1926 = vmatpush3.bf16.msra.mxu1 %v1587_v29 }
 0x910   : > { %1614 = vmatprep.subr.bf16.mxu0 %v1597_v8  ;;  %1927 = vmatprep.subr.bf16.mxu1 %v2173_v6 }
 0x911   : > { %v1591_v33 = vpop.permute.xlu0 %1590  ;;  %1644 = vmatprep.mubr.bf16.mxu0 %v2164_v3  ;;  %v1572_v40 = vpop.permute.xlu1 %1571 }
 0x912   : > { %v1599_v35 = vsel %vm1016_vm4, %v1591_v33, %v1593_v34 }
 0x913   : > { %1615 = vmatpush1.bf16.msra.mxu0 %v1596_v10  ;;  %1928 = vmatpush3.bf16.msra.mxu1 %v1593_v34 }
 0x914   : > { %1616 = vmatprep.subr.bf16.mxu0 %v1599_v35 }
 0x915   : > { %v1589_v39 = vpop.permute.xlu0 %1588 }
 0x916   : > { %v1598_v20 = vsel %vm1016_vm4, %v1589_v39, %v1591_v33 }
 0x917   : > { %1617 = vmatpush1.bf16.msra.mxu0 %v1598_v20 }
 0x919   : > { %v1574_v7 = vpop.permute.xlu0 %1573 }
 0x91a   : > { %v1575_v41 = vsel %vm996_vm7, %v1572_v40, %v1574_v7 }
 0x91b   : > { %1844 = vmatmul.mubr.msk.bf16.vlgmr.msra.gmra.mrb[12].mxu0 %vm764_vm13, %v1575_v41  ;;  %1930 = vmatmul.mubr.msk.bf16.vlgmr.msra.gmra.mrb[20].mxu1 %vm764_vm13, %v1575_v41 }
 0x922   : > { %v1700_v59 = vpop.permute.xlu1 %1699 }
 0x9d1   : > { %v1433_v3 = vpop.f32.mrb[12].mxu1 }
 0x9d2   : > { %v1392_v6 = vpop.f32.mrb[4].mxu0  ;;  %v1911_v43 = vpop.f32.mrb[13].mxu1 }
 0x9d3   : > { %v1394_v32 = vpop.f32.mrb[5].mxu0  ;;  %v1436_v46 = vpop.f32.mrb[14].mxu1 }
 0x9d4   : > { %v1396_v37 = vpop.f32.mrb[6].mxu0  ;;  %v1912_v47 = vpop.f32.mrb[15].mxu1 }
 0x9d5   : > { %v1397_v49 = vpop.f32.mrb[7].mxu0 }
 0x9dd   : > { %v1559_v38 = vpop.f32.mrb[16].mxu1 }
 0x9de   : > { %v1560_v50 = vadd.f32 %v1559_v38, %v1433_v3  ;;  %v1921_v51 = vpop.f32.mrb[17].mxu1 }
 0x9df   : > { %v1562_v48 = vpop.f32.mrb[18].mxu1 }
 0x9e0   : > { %v1922_v55 = vpop.f32.mrb[19].mxu1 }
 0x9e1   : > { %v1518_v56 = vpop.f32.mrb[8].mxu0 }
 0x9e2   : > { %v1519_v58 = vadd.f32 %v1518_v56, %v1392_v6  ;;  %v1520_v57 = vpop.f32.mrb[9].mxu0 }
 0x9e3   : > { %v1521_v60 = vadd.f32 %v1520_v57, %v1394_v32  ;;  %v1522_v61 = vpop.f32.mrb[10].mxu0 }
 0x9e4   : > { %v1523_v54 = vpop.f32.mrb[11].mxu0 }
 0x9ee   : > { %v1646_v62 = vpop.f32.mrb[12].mxu0  ;;  %v1687_v63 = vpop.f32.mrb[20].mxu1 }
 0x9ef   : > { %v1693_v0 = vadd.f32 %v1646_v62, %v1519_v58  ;;  %v1695_v1 = vadd.f32 %v1687_v63, %v1560_v50  ;;  %v1648_v2 = vpop.f32.mrb[13].mxu0  ;;  %v1931_v4 = vpop.f32.mrb[21].mxu1 }
 0x9f0   : > { %v1694_v5 = vadd.f32 %v1648_v2, %v1521_v60  ;;  %v1650_v53 = vpop.f32.mrb[14].mxu0  ;;  %v1690_v28 = vpop.f32.mrb[22].mxu1 }
 0x9f1   : > { %v1702_v9 = vadd.f32 %v1700_v59, %v1693_v0  ;;  %v1704_v11 = vadd.f32 %v1700_v59, %v1695_v1  ;;  %v1651_v31 = vpop.f32.mrb[15].mxu0  ;;  %v1932_v12 = vpop.f32.mrb[23].mxu1 }
 0x9f2   : > { %v1703_v13 = vadd.f32 %v1700_v59, %v1694_v5 }
 0x9f3   : > { %v1705_v36 = vmax.f32 %v1702_v9, 0.0  ;;  %v1707_v14 = vmax.f32 %v1704_v11, 0.0 }
 0x9f4   : > { %v1706_v42 = vmax.f32 %v1703_v13, 0.0 }
 0x9f5   : > { %1708 = vst [vmem:[%s322_s30] sm:$0xff] %v1705_v36  ;;  %1710 = vst.msk [vmem:[%s322_s30 + $0x10] sm:$0xff] %vm528_vm12, %v1707_v14 }
 0x9f6   : > { %1709 = vst [vmem:[%s322_s30 + $0x8] sm:$0xff] %v1706_v42 }
 0x9f7   : > { %2102 = shalt.err (!%p2099_p1)
}
 0x9f8   : > { %s2103_s14 = scalar_lea.hbm %s2916_s23, 384  ;;  %s2107_s15 = scalar_lea.hbm %s2968_s7, 768 }
 0x9f9   : > { %p2104_p2 = scmp.ne.s32.totalorder %s2916_s23, %s2103_s14  ;;  %p2108_p0 = scmp.lt.u32.totalorder %s2916_s23, %s2968_s7 }
 0x9fa   : > { %p2109_p4 = scmp.lt.u32.totalorder %s2107_s15, %s2103_s14  ;;  %p2111_p9 = scmp.lt.u32.totalorder %s2103_s14, %s2916_s23 }
 0x9fb   : > { %p2105_p7 = pnand %p2104_p2, %p2312_p8 }
 0x9fc   : > { %p2110_p6 = por %p2109_p4, %p2108_p0 }
 0x9fd   : > { %p2106_p3 = pneg %p2105_p7 }
 0x9fe   : > { %p2112_p12 = por %p2111_p9, %p2110_p6 }
 0xa00   : > { %p2113_p13 = pnand %p2112_p12, %p2106_p3 }
 0xa02   : > { %2116 = shalt.err (!%p2113_p13)
}
 0xa03   : > { %1953 = dma.vmem_to_hbm [thread:$0]  (%p2312_p8), %s2918_s10, 384, %s2916_s23, %s1712_s28  }
 0xa04 PF: > { %s1738_s30 = sand.u32 1, %s2147_s24   ;;  %p3045_p11 = scmp.ne.s32.totalorder %s2994_s8, 0 }
 0xa05   : > { %p3046_p5 = scmp.ge.s32.totalorder %s2159_s27, 2  ;;  %s1739_s19 = scalar_lea.sflag [#allocation6], %s1738_s30 }
 0xa07   : > { %p1964_p10 = pnand %p3046_p5, %p3045_p11 }
 0xa09   : > { %2142 = dma.done.wait (!%p1964_p10), %s1739_s19, 384  }
 0xa0a   : > { %2144 = vsyncadd (!%p1964_p10), %s1739_s19, 4294966912  ;;  %p21_p1 = scmp.ge.s32.totalorder %s2268_s12, 4   ;;  %s3047_s24 = smov %s2151_s25 }
 0xa0b   : > { %s3048_s25 = smov %s2155_s26  ;;  %s3049_s26 = smov %s2304_s18 }
 0xa0c   : > { %s3050_s27 = smov %s2268_s12  ;;  %23 = sbr.rel (!%p21_p1) target bundleno = 8 (0x8), region = 100 }
 0xa13   :  { %1744 = vsyncpa [#allocation5], 1 }
 0xa14   :  { %1746 = vsyncpa [#allocation5 + $0x1], 1 }
 0xa15   :  { %1747 = vsyncpa [#allocation8], 1 }
 0xa16   :  { %1748 = vsyncpa [#allocation6], 1 }
 0xa17   :  { %1750 = vsyncpa [#allocation6 + $0x1], 1 }

</bundles_post_ra>
